<compile_context>
chip_gen: v6e
topology: v6e:2x2x1
jax: 0.10.0
libtpu: 0.0.40
codegen_flags: <defaults>
</compile_context>

<pallas_src>
import functools
import math

import jax
import jax.numpy as jnp
from jax.experimental import pallas as pl
from jax.experimental.pallas import tpu as pltpu


def _round_up(x: int, m: int) -> int:
    return (x + m - 1) // m * m


def _conv_bn_relu_kernel(x_ref, w_ref, shift_ref, o_ref, *,
                         dilation: int, row_stride: int, tm: int):
    """Fused dilated-3x3 conv + folded-BN + ReLU for one flattened-spatial tile.

    x_ref    : (1, L, Cin)   f32  whole padded, flattened image of this batch elem
    w_ref    : (9, Cin, TCO) bf16 tap weights with BN scale folded in (VMEM-resident)
    shift_ref: (1, TCO)      f32  folded BN shift = beta - mean * gamma/sqrt(var+eps)
    o_ref    : (1, TM, TCO)       output tile (flattened padded-width rows)
    """
    row0 = pl.multiple_of(pl.program_id(2) * tm, 8)
    offs = [kh * dilation * row_stride + kw * dilation
            for kh in range(3) for kw in range(3)]

    def tap(t):
        # Contiguous row-shifted 2-D slice of the flattened image, cast to bf16
        # at the MXU boundary; f32 accumulation on the MXU.
        lhs = x_ref[0, pl.ds(row0 + offs[t], tm), :].astype(jnp.bfloat16)
        return jnp.dot(lhs, w_ref[t], preferred_element_type=jnp.float32)

    acc = tap(0)                       # init with first tap: no zero-fill pass
    for t in range(1, 9):
        acc = acc + tap(t)

    y = acc + shift_ref[0, :]          # BN scale already folded into the weights
    o_ref[0, :, :] = jnp.maximum(y, 0.0).astype(o_ref.dtype)


@functools.partial(jax.jit, static_argnames=("rate", "eps"))
def atrous_conv_bn_act(x, weight, gamma, beta, running_mean, running_var,
                       *, rate: int, eps: float = 1e-5):
    """y = ReLU(BN_eval(conv2d(x, weight, k=3, padding=rate, dilation=rate)))."""
    N, Cin, H, W = x.shape
    Cout = weight.shape[0]
    d = int(rate)
    out_dtype = x.dtype

    # ---- one-time layout changes & BN folding (plain JAX, outside the kernel) ----
    # TODO(synk): store the image as bf16 once packed-dtype unaligned dynamic
    #             sublane slices are validated; that would halve image DMA + VMEM.
    x_nhwc = jnp.transpose(x, (0, 2, 3, 1)).astype(jnp.float32)      # NCHW -> NHWC
    w_taps = jnp.transpose(weight, (2, 3, 1, 0)).reshape(9, Cin, Cout)

    inv_std = jax.lax.rsqrt(running_var.astype(jnp.float32) + eps)
    scale = gamma.astype(jnp.float32) * inv_std
    shift = beta.astype(jnp.float32) - running_mean.astype(jnp.float32) * scale
    # Fold the BN scale into the tap weights in f32, THEN cast once to bf16.
    w_folded = (w_taps.astype(jnp.float32) * scale[None, None, :]).astype(jnp.bfloat16)

    # Zero-pad channels to lane-aligned multiples of 128 (no-op for 128/256-wide
    # real layers); keeps every matmul operand and the output store lane-dense.
    Cin_p = _round_up(Cin, 128)
    Cout_p = _round_up(Cout, 128)

    # Flattened-spatial geometry: pad width to Wp and flatten (rows, Wp) so each
    # tap is a contiguous row shift of kh*d*Wp + kw*d.  Wp is rounded so d*Wp is
    # a multiple of 8 -> the kh row shifts stay sublane aligned (kw*d may not).
    # The Wp-W junk columns per row are cropped in the wrapper afterwards.
    Wp = _round_up(W + 2 * d, 8 // math.gcd(d, 8))
    M = H * Wp                                   # flattened output rows (pre-crop)
    TM = min(512, _round_up(M, 8))               # output row tile (multiple of 8)
    M_out = _round_up(M, TM)
    L_needed = M_out + 2 * d * Wp + 2 * d        # last flattened row ever read
    Hp = max(H + 2 * d, -(-L_needed // Wp))      # total padded image rows
    L = Hp * Wp

    xp = jnp.pad(
        x_nhwc, ((0, 0), (d, Hp - H - d), (d, Wp - W - d), (0, Cin_p - Cin))
    ).reshape(N, L, Cin_p)
    w_p = jnp.pad(w_folded, ((0, 0), (0, Cin_p - Cin), (0, Cout_p - Cout)))
    shift_p = jnp.pad(shift, (0, Cout_p - Cout)).reshape(1, Cout_p)

    # Cout tile: 256 for the 256x256 MXU (v6e/v7x) when possible; 128 on v5e
    # (4x128x128 MXU gains nothing from 256-wide tiles; smaller tile frees VMEM).
    TCO = 256 if Cout_p % 256 == 0 else 128
    try:
        kind = jax.devices()[0].device_kind.lower()
        if "v5 lite" in kind or "v5e" in kind or "v5lite" in kind:
            TCO = 128
    except Exception:
        pass
    n_co = Cout_p // TCO
    n_m = M_out // TM

    # Input block: whole padded image of batch element n; block index depends only
    # on n, so it is DMA'd once per image and reused for all (co, m) tiles.
    # Single-buffer it when the API allows (the second buffer is pure VMEM waste).
    x_index_map = lambda n, co, m: (n, 0, 0)
    x_bufs = 2
    x_spec = pl.BlockSpec((1, L, Cin_p), x_index_map)
    if hasattr(pl, "Buffered"):
        try:
            x_spec = pl.BlockSpec((1, L, Cin_p), x_index_map,
                                  pipeline_mode=pl.Buffered(1))
            x_bufs = 1
        except Exception:
            pass

    # VMEM budget from the actual buffer footprint, capped by physical VMEM.
    out_itemsize = out_dtype.itemsize
    needed = (x_bufs * L * Cin_p * 4                     # image (f32)
              + 2 * 9 * Cin_p * TCO * 2                  # weights (bf16, dbl-buf)
              + 2 * TCO * 4                              # shift (dbl-buf)
              + 2 * TM * TCO * out_itemsize              # output tiles (dbl-buf)
              + 2 * TM * TCO * 4)                        # f32 accumulator + slack
    cap = 56 * 1024 * 1024                               # safe on v7x (64 MiB/TC)
    try:
        phys = int(getattr(pltpu.get_tpu_info(), "vmem_capacity_bytes", 0) or 0)
        if phys > 0:
            cap = max(cap, phys - 16 * 1024 * 1024)      # ~112 MiB on v5e/v6e
    except Exception:
        pass
    vmem_limit = int(min(max(needed + (4 << 20), 16 << 20), cap))

    kernel = functools.partial(
        _conv_bn_relu_kernel, dilation=d, row_stride=Wp, tm=TM)

    yf = pl.pallas_call(
        kernel,
        out_shape=jax.ShapeDtypeStruct((N, M_out, Cout_p), out_dtype),
        grid=(N, n_co, n_m),
        in_specs=[
            x_spec,
            # Weights / BN shift: block index constant over (n, m) -> VMEM-resident.
            pl.BlockSpec((9, Cin_p, TCO), lambda n, co, m: (0, 0, co)),
            pl.BlockSpec((1, TCO), lambda n, co, m: (0, co)),
        ],
        out_specs=pl.BlockSpec((1, TM, TCO), lambda n, co, m: (n, m, co)),
        compiler_params=pltpu.CompilerParams(
            # No cross-step reduction -> every axis independent.  Batch (N) is the
            # outermost axis so a v7x cross-core split lands on N first and never
            # duplicates the per-image fetch when N > 1.
            dimension_semantics=("parallel", "parallel", "parallel"),
            vmem_limit_bytes=vmem_limit,
        ),
    )(xp, w_p, shift_p)

    # Crop trailing junk rows, the junk columns per row, and padded channels.
    y = yf[:, :M, :Cout].reshape(N, H, Wp, Cout)[:, :, :W, :]
    return jnp.transpose(y, (0, 3, 1, 2))                          # NHWC -> NCHW


if __name__ == "__main__":
    key = jax.random.PRNGKey(0)
    k_x, k_w = jax.random.split(key)

    # Small shapes consistent with AtrousConvBNAct(in_channels=4, out_channels=8, rate=2).
    N, Cin, Cout, H, W, rate = 2, 4, 8, 16, 16, 2
    x = jax.random.normal(k_x, (N, Cin, H, W), dtype=jnp.float32)
    weight = 0.1 * jax.random.normal(k_w, (Cout, Cin, 3, 3), dtype=jnp.float32)

    # Fresh nn.BatchNorm2d parameters / running statistics (eval-mode semantics).
    gamma = jnp.ones((Cout,), jnp.float32)
    beta = jnp.zeros((Cout,), jnp.float32)
    running_mean = jnp.zeros((Cout,), jnp.float32)
    running_var = jnp.ones((Cout,), jnp.float32)

    out = atrous_conv_bn_act(x, weight, gamma, beta, running_mean, running_var,
                             rate=rate)
    out = jax.block_until_ready(out)
    assert out.shape == (N, Cout, H, W), out.shape

    # Cross-check against an exact-f32 XLA reference (dilated conv + eval-BN + ReLU).
    conv = jax.lax.conv_general_dilated(
        x, weight, window_strides=(1, 1),
        padding=((rate, rate), (rate, rate)), rhs_dilation=(rate, rate),
        dimension_numbers=("NCHW", "OIHW", "NCHW"),
        precision=jax.lax.Precision.HIGHEST)
    inv_std = 1.0 / jnp.sqrt(running_var + 1e-5)
    ref = jnp.maximum(
        conv * (gamma * inv_std)[None, :, None, None]
        + (beta - running_mean * gamma * inv_std)[None, :, None, None], 0.0)

    # bf16 MXU operands (weights + cast image slices) -> allow bf16-level error.
    max_err = float(jnp.max(jnp.abs(out - ref)))
    tol = 3e-2 * max(1.0, float(jnp.max(jnp.abs(ref))))
    if max_err > tol:
        raise SystemExit(f"mismatch vs reference: max abs err = {max_err} (tol {tol})")

    print("KERNEL_OK")
</pallas_src>

<mosaic_0001>
module attributes {stable_mosaic.version = 11 : i64} {
  func.func @_conv_bn_relu_kernel(%arg0: i32, %arg1: i32, %arg2: i32, %arg3: memref<1x420x128xf32, #tpu.memory_space<vmem>>, %arg4: memref<9x128x128xbf16, #tpu.memory_space<vmem>>, %arg5: memref<1x128xf32, #tpu.memory_space<vmem>>, %arg6: memref<1x320x128xf32, #tpu.memory_space<vmem>>) attributes {dimension_semantics = [#tpu.dimension_semantics<parallel>, #tpu.dimension_semantics<parallel>, #tpu.dimension_semantics<parallel>], iteration_bounds = array<i64: 2, 1, 1>, scalar_prefetch = 0 : i64, scratch_operands = 0 : i64, tpu.core_type = #tpu.core_type<tc>, window_params = [{pipeline_mode = #tpu.pipeline_mode<synchronous>, transform_indices = @transform_0, window_bounds = array<i64: 1, 420, 128>}, {transform_indices = @transform_1, window_bounds = array<i64: 9, 128, 128>}, {transform_indices = @transform_2, window_bounds = array<i64: 1, 128>}, {transform_indices = @transform_3, window_bounds = array<i64: 1, 320, 128>}]} {
    %c320_i32 = arith.constant 320 : i32
    %0 = arith.muli %arg2, %c320_i32 : i32
    %1 = tpu.assume_multiple %0, 8 : i32
    %c0_i32 = arith.constant 0 : i32
    %2 = arith.addi %1, %c0_i32 : i32
    %c0 = arith.constant 0 : index
    %3 = arith.index_cast %2 : i32 to index
    %c0_0 = arith.constant 0 : index
    %4 = vector.load %arg3[%c0, %3, %c0_0] : memref<1x420x128xf32, #tpu.memory_space<vmem>>, vector<1x320x128xf32>
    %5 = vector.shape_cast %4 : vector<1x320x128xf32> to vector<320x128xf32>
    %6 = arith.truncf %5 : vector<320x128xf32> to vector<320x128xbf16>
    %c0_1 = arith.constant 0 : index
    %c0_2 = arith.constant 0 : index
    %c0_3 = arith.constant 0 : index
    %7 = vector.load %arg4[%c0_1, %c0_2, %c0_3] : memref<9x128x128xbf16, #tpu.memory_space<vmem>>, vector<1x128x128xbf16>
    %8 = vector.shape_cast %7 : vector<1x128x128xbf16> to vector<128x128xbf16>
    %cst = arith.constant dense<0.000000e+00> : vector<320x128xf32>
    %9 = tpu.matmul %6, %8, %cst {dimension_numbers = #tpu.dot_dimension_numbers<[1], [0], [0], [1], [0, 0, 1, 1], [], []>} : vector<320x128xbf16>, vector<128x128xbf16>, vector<320x128xf32> -> vector<320x128xf32>
    %c2_i32 = arith.constant 2 : i32
    %10 = arith.addi %1, %c2_i32 : i32
    %c0_4 = arith.constant 0 : index
    %11 = arith.index_cast %10 : i32 to index
    %c0_5 = arith.constant 0 : index
    %12 = vector.load %arg3[%c0_4, %11, %c0_5] : memref<1x420x128xf32, #tpu.memory_space<vmem>>, vector<1x320x128xf32>
    %13 = vector.shape_cast %12 : vector<1x320x128xf32> to vector<320x128xf32>
    %14 = arith.truncf %13 : vector<320x128xf32> to vector<320x128xbf16>
    %c1 = arith.constant 1 : index
    %c0_6 = arith.constant 0 : index
    %c0_7 = arith.constant 0 : index
    %15 = vector.load %arg4[%c1, %c0_6, %c0_7] : memref<9x128x128xbf16, #tpu.memory_space<vmem>>, vector<1x128x128xbf16>
    %16 = vector.shape_cast %15 : vector<1x128x128xbf16> to vector<128x128xbf16>
    %cst_8 = arith.constant dense<0.000000e+00> : vector<320x128xf32>
    %17 = tpu.matmul %14, %16, %cst_8 {dimension_numbers = #tpu.dot_dimension_numbers<[1], [0], [0], [1], [0, 0, 1, 1], [], []>} : vector<320x128xbf16>, vector<128x128xbf16>, vector<320x128xf32> -> vector<320x128xf32>
    %18 = arith.addf %9, %17 : vector<320x128xf32>
    %c4_i32 = arith.constant 4 : i32
    %19 = arith.addi %1, %c4_i32 : i32
    %c0_9 = arith.constant 0 : index
    %20 = arith.index_cast %19 : i32 to index
    %c0_10 = arith.constant 0 : index
    %21 = vector.load %arg3[%c0_9, %20, %c0_10] : memref<1x420x128xf32, #tpu.memory_space<vmem>>, vector<1x320x128xf32>
    %22 = vector.shape_cast %21 : vector<1x320x128xf32> to vector<320x128xf32>
    %23 = arith.truncf %22 : vector<320x128xf32> to vector<320x128xbf16>
    %c2 = arith.constant 2 : index
    %c0_11 = arith.constant 0 : index
    %c0_12 = arith.constant 0 : index
    %24 = vector.load %arg4[%c2, %c0_11, %c0_12] : memref<9x128x128xbf16, #tpu.memory_space<vmem>>, vector<1x128x128xbf16>
    %25 = vector.shape_cast %24 : vector<1x128x128xbf16> to vector<128x128xbf16>
    %cst_13 = arith.constant dense<0.000000e+00> : vector<320x128xf32>
    %26 = tpu.matmul %23, %25, %cst_13 {dimension_numbers = #tpu.dot_dimension_numbers<[1], [0], [0], [1], [0, 0, 1, 1], [], []>} : vector<320x128xbf16>, vector<128x128xbf16>, vector<320x128xf32> -> vector<320x128xf32>
    %27 = arith.addf %18, %26 : vector<320x128xf32>
    %c40_i32 = arith.constant 40 : i32
    %28 = arith.addi %1, %c40_i32 : i32
    %c0_14 = arith.constant 0 : index
    %29 = arith.index_cast %28 : i32 to index
    %c0_15 = arith.constant 0 : index
    %30 = vector.load %arg3[%c0_14, %29, %c0_15] : memref<1x420x128xf32, #tpu.memory_space<vmem>>, vector<1x320x128xf32>
    %31 = vector.shape_cast %30 : vector<1x320x128xf32> to vector<320x128xf32>
    %32 = arith.truncf %31 : vector<320x128xf32> to vector<320x128xbf16>
    %c3 = arith.constant 3 : index
    %c0_16 = arith.constant 0 : index
    %c0_17 = arith.constant 0 : index
    %33 = vector.load %arg4[%c3, %c0_16, %c0_17] : memref<9x128x128xbf16, #tpu.memory_space<vmem>>, vector<1x128x128xbf16>
    %34 = vector.shape_cast %33 : vector<1x128x128xbf16> to vector<128x128xbf16>
    %cst_18 = arith.constant dense<0.000000e+00> : vector<320x128xf32>
    %35 = tpu.matmul %32, %34, %cst_18 {dimension_numbers = #tpu.dot_dimension_numbers<[1], [0], [0], [1], [0, 0, 1, 1], [], []>} : vector<320x128xbf16>, vector<128x128xbf16>, vector<320x128xf32> -> vector<320x128xf32>
    %36 = arith.addf %27, %35 : vector<320x128xf32>
    %c42_i32 = arith.constant 42 : i32
    %37 = arith.addi %1, %c42_i32 : i32
    %c0_19 = arith.constant 0 : index
    %38 = arith.index_cast %37 : i32 to index
    %c0_20 = arith.constant 0 : index
    %39 = vector.load %arg3[%c0_19, %38, %c0_20] : memref<1x420x128xf32, #tpu.memory_space<vmem>>, vector<1x320x128xf32>
    %40 = vector.shape_cast %39 : vector<1x320x128xf32> to vector<320x128xf32>
    %41 = arith.truncf %40 : vector<320x128xf32> to vector<320x128xbf16>
    %c4 = arith.constant 4 : index
    %c0_21 = arith.constant 0 : index
    %c0_22 = arith.constant 0 : index
    %42 = vector.load %arg4[%c4, %c0_21, %c0_22] : memref<9x128x128xbf16, #tpu.memory_space<vmem>>, vector<1x128x128xbf16>
    %43 = vector.shape_cast %42 : vector<1x128x128xbf16> to vector<128x128xbf16>
    %cst_23 = arith.constant dense<0.000000e+00> : vector<320x128xf32>
    %44 = tpu.matmul %41, %43, %cst_23 {dimension_numbers = #tpu.dot_dimension_numbers<[1], [0], [0], [1], [0, 0, 1, 1], [], []>} : vector<320x128xbf16>, vector<128x128xbf16>, vector<320x128xf32> -> vector<320x128xf32>
    %45 = arith.addf %36, %44 : vector<320x128xf32>
    %c44_i32 = arith.constant 44 : i32
    %46 = arith.addi %1, %c44_i32 : i32
    %c0_24 = arith.constant 0 : index
    %47 = arith.index_cast %46 : i32 to index
    %c0_25 = arith.constant 0 : index
    %48 = vector.load %arg3[%c0_24, %47, %c0_25] : memref<1x420x128xf32, #tpu.memory_space<vmem>>, vector<1x320x128xf32>
    %49 = vector.shape_cast %48 : vector<1x320x128xf32> to vector<320x128xf32>
    %50 = arith.truncf %49 : vector<320x128xf32> to vector<320x128xbf16>
    %c5 = arith.constant 5 : index
    %c0_26 = arith.constant 0 : index
    %c0_27 = arith.constant 0 : index
    %51 = vector.load %arg4[%c5, %c0_26, %c0_27] : memref<9x128x128xbf16, #tpu.memory_space<vmem>>, vector<1x128x128xbf16>
    %52 = vector.shape_cast %51 : vector<1x128x128xbf16> to vector<128x128xbf16>
    %cst_28 = arith.constant dense<0.000000e+00> : vector<320x128xf32>
    %53 = tpu.matmul %50, %52, %cst_28 {dimension_numbers = #tpu.dot_dimension_numbers<[1], [0], [0], [1], [0, 0, 1, 1], [], []>} : vector<320x128xbf16>, vector<128x128xbf16>, vector<320x128xf32> -> vector<320x128xf32>
    %54 = arith.addf %45, %53 : vector<320x128xf32>
    %c80_i32 = arith.constant 80 : i32
    %55 = arith.addi %1, %c80_i32 : i32
    %c0_29 = arith.constant 0 : index
    %56 = arith.index_cast %55 : i32 to index
    %c0_30 = arith.constant 0 : index
    %57 = vector.load %arg3[%c0_29, %56, %c0_30] : memref<1x420x128xf32, #tpu.memory_space<vmem>>, vector<1x320x128xf32>
    %58 = vector.shape_cast %57 : vector<1x320x128xf32> to vector<320x128xf32>
    %59 = arith.truncf %58 : vector<320x128xf32> to vector<320x128xbf16>
    %c6 = arith.constant 6 : index
    %c0_31 = arith.constant 0 : index
    %c0_32 = arith.constant 0 : index
    %60 = vector.load %arg4[%c6, %c0_31, %c0_32] : memref<9x128x128xbf16, #tpu.memory_space<vmem>>, vector<1x128x128xbf16>
    %61 = vector.shape_cast %60 : vector<1x128x128xbf16> to vector<128x128xbf16>
    %cst_33 = arith.constant dense<0.000000e+00> : vector<320x128xf32>
    %62 = tpu.matmul %59, %61, %cst_33 {dimension_numbers = #tpu.dot_dimension_numbers<[1], [0], [0], [1], [0, 0, 1, 1], [], []>} : vector<320x128xbf16>, vector<128x128xbf16>, vector<320x128xf32> -> vector<320x128xf32>
    %63 = arith.addf %54, %62 : vector<320x128xf32>
    %c82_i32 = arith.constant 82 : i32
    %64 = arith.addi %1, %c82_i32 : i32
    %c0_34 = arith.constant 0 : index
    %65 = arith.index_cast %64 : i32 to index
    %c0_35 = arith.constant 0 : index
    %66 = vector.load %arg3[%c0_34, %65, %c0_35] : memref<1x420x128xf32, #tpu.memory_space<vmem>>, vector<1x320x128xf32>
    %67 = vector.shape_cast %66 : vector<1x320x128xf32> to vector<320x128xf32>
    %68 = arith.truncf %67 : vector<320x128xf32> to vector<320x128xbf16>
    %c7 = arith.constant 7 : index
    %c0_36 = arith.constant 0 : index
    %c0_37 = arith.constant 0 : index
    %69 = vector.load %arg4[%c7, %c0_36, %c0_37] : memref<9x128x128xbf16, #tpu.memory_space<vmem>>, vector<1x128x128xbf16>
    %70 = vector.shape_cast %69 : vector<1x128x128xbf16> to vector<128x128xbf16>
    %cst_38 = arith.constant dense<0.000000e+00> : vector<320x128xf32>
    %71 = tpu.matmul %68, %70, %cst_38 {dimension_numbers = #tpu.dot_dimension_numbers<[1], [0], [0], [1], [0, 0, 1, 1], [], []>} : vector<320x128xbf16>, vector<128x128xbf16>, vector<320x128xf32> -> vector<320x128xf32>
    %72 = arith.addf %63, %71 : vector<320x128xf32>
    %c84_i32 = arith.constant 84 : i32
    %73 = arith.addi %1, %c84_i32 : i32
    %c0_39 = arith.constant 0 : index
    %74 = arith.index_cast %73 : i32 to index
    %c0_40 = arith.constant 0 : index
    %75 = vector.load %arg3[%c0_39, %74, %c0_40] : memref<1x420x128xf32, #tpu.memory_space<vmem>>, vector<1x320x128xf32>
    %76 = vector.shape_cast %75 : vector<1x320x128xf32> to vector<320x128xf32>
    %77 = arith.truncf %76 : vector<320x128xf32> to vector<320x128xbf16>
    %c8 = arith.constant 8 : index
    %c0_41 = arith.constant 0 : index
    %c0_42 = arith.constant 0 : index
    %78 = vector.load %arg4[%c8, %c0_41, %c0_42] : memref<9x128x128xbf16, #tpu.memory_space<vmem>>, vector<1x128x128xbf16>
    %79 = vector.shape_cast %78 : vector<1x128x128xbf16> to vector<128x128xbf16>
    %cst_43 = arith.constant dense<0.000000e+00> : vector<320x128xf32>
    %80 = tpu.matmul %77, %79, %cst_43 {dimension_numbers = #tpu.dot_dimension_numbers<[1], [0], [0], [1], [0, 0, 1, 1], [], []>} : vector<320x128xbf16>, vector<128x128xbf16>, vector<320x128xf32> -> vector<320x128xf32>
    %81 = arith.addf %72, %80 : vector<320x128xf32>
    %c0_44 = arith.constant 0 : index
    %c0_45 = arith.constant 0 : index
    %82 = vector.load %arg5[%c0_44, %c0_45] : memref<1x128xf32, #tpu.memory_space<vmem>>, vector<1x128xf32>
    %83 = vector.shape_cast %82 : vector<1x128xf32> to vector<128xf32>
    %84 = vector.shape_cast %83 : vector<128xf32> to vector<1x128xf32>
    %85 = vector.broadcast %84 : vector<1x128xf32> to vector<320x128xf32>
    %86 = arith.addf %81, %85 : vector<320x128xf32>
    %cst_46 = arith.constant 0.000000e+00 : f32
    %87 = vector.broadcast %cst_46 : f32 to vector<320x128xf32>
    %88 = arith.maximumf %86, %87 : vector<320x128xf32>
    %c0_47 = arith.constant 0 : index
    %c0_48 = arith.constant 0 : index
    %c0_49 = arith.constant 0 : index
    %89 = vector.load %arg6[%c0_47, %c0_48, %c0_49] : memref<1x320x128xf32, #tpu.memory_space<vmem>>, vector<1x320x128xf32>
    %90 = vector.shape_cast %89 : vector<1x320x128xf32> to vector<320x128xf32>
    %91 = vector.shape_cast %88 : vector<320x128xf32> to vector<1x320x128xf32>
    tpu.vector_store %arg6[%c0_47, %c0_48, %c0_49], %91 {strides = array<i32>} : memref<1x320x128xf32, #tpu.memory_space<vmem>>, vector<1x320x128xf32>,
    return
  }
  func.func @transform_0(%arg0: i32, %arg1: i32, %arg2: i32) -> (i32, i32, i32) {
    %c0_i32 = arith.constant 0 : i32
    %c0_i32_0 = arith.constant 0 : i32
    %c0_i32_1 = arith.constant 0 : i32
    return %arg0, %c0_i32, %c0_i32_0 : i32, i32, i32
  }
  func.func @transform_1(%arg0: i32, %arg1: i32, %arg2: i32) -> (i32, i32, i32) {
    %c0_i32 = arith.constant 0 : i32
    %c0_i32_0 = arith.constant 0 : i32
    %c0_i32_1 = arith.constant 0 : i32
    return %c0_i32, %c0_i32_0, %arg1 : i32, i32, i32
  }
  func.func @transform_2(%arg0: i32, %arg1: i32, %arg2: i32) -> (i32, i32) {
    %c0_i32 = arith.constant 0 : i32
    %c0_i32_0 = arith.constant 0 : i32
    return %c0_i32, %arg1 : i32, i32
  }
  func.func @transform_3(%arg0: i32, %arg1: i32, %arg2: i32) -> (i32, i32, i32) {
    %c0_i32 = arith.constant 0 : i32
    return %arg0, %arg2, %arg1 : i32, i32, i32
  }
}

</mosaic_0001>

<bundles_post_ra>
// kernel: atrous_conv_bn_act.1
= control target key start
LH: loop header
LB: loop body
LE: loop exit
PB: predicated region body
PF: predicated region fallthrough
CT: control target
= control target key end

     0   :  { %s5122_s12 = smov 0   ;;  %s5124_s13 = smov 0   ;;  %s6799_s0 = inlined_call_operand.vmem [shape: f32[2,420,128], index: 0, kind: input, shape index: {}]   ;;  %s6800_s1 = inlined_call_operand.vmem [shape: bf16[9,128,128], index: 1, kind: input, shape index: {}]   ;;  %s6801_s2 = inlined_call_operand.vmem [shape: f32[1,128], index: 2, kind: input, shape index: {}]   ;;  %s6802_s3 = inlined_call_operand.vmem [shape: f32[2,320,128], index: 3, kind: output, shape index: {}]  }
   0x1   :  { %s5126_s14 = smov 0  }
   0x2 LB: > { %s32_s15 = sadd.s32 1, %s5096_s13  ;;  %p3682_p0 = scmp.ge.s32.totalorder %s5100_s14, 1  ;;  %s5100_s14 = sphi %s5126_s14, %s13_s14   ;;  %s5096_s13 = sphi %s5124_s13, %s7043_s13   ;;  %s5092_s12 = sphi %s5122_s12, %s7042_s12  }
   0x3   : > { %p34_p1 = scmp.ge.s32.totalorder %s32_s15, 2  ;;  %p177_p2 = scmp.lt.s32.totalorder %s5100_s14, 3 }
   0x5   : > { %s7045_s15 = smov (%p34_p1, %s32_s15), 0  ;;  %p178_p3 = pnand %p3682_p0, %p177_p2 }
   0x7   : > { %181 = sbr.rel (%p178_p3) target bundleno = 605 (0x25d), region = 32 }
   0xc   : > { %v5006_v0 = vld [vmem:[%s6800_s1 + $0x78] sm:$0xff]   ;;  %p215_p4 = scmp.lt.s32.totalorder %s5092_s12, 1  ;;  %v5007_v1 = vld [vmem:[%s6800_s1 + $0x70] sm:$0xff]   ;;  %v5008_v2 = vld [vmem:[%s6800_s1 + $0x68] sm:$0xff]  }
   0xd   : > { %4460 = vmatprep.subr.bf16.mxu0 %v5006_v0  ;;  %4964 = vmatprep.subr.bf16.mxu1 %v5006_v0  ;;  %v5009_v3 = vld [vmem:[%s6800_s1 + $0x60] sm:$0xff]   ;;  %v5010_v10 = vld [vmem:[%s6800_s1 + $0x58] sm:$0xff]   ;;  %v5011_v11 = vld [vmem:[%s6800_s1 + $0x50] sm:$0xff]  }
   0xe   : > { %s7047_s12 = smov (!%p215_p4, %s5092_s12), 1  ;;  %4461 = vmatpush3.bf16.msra.mxu0 %v5006_v0  ;;  %4972 = vmatpush3.bf16.msra.mxu1 %v5006_v0  ;;  %v5012_v15 = vld [vmem:[%s6800_s1 + $0x48] sm:$0xff]   ;;  %v5013_v18 = vld [vmem:[%s6800_s1 + $0x40] sm:$0xff]   ;;  %v5014_v24 = vld [vmem:[%s6800_s1 + $0x38] sm:$0xff]  }
   0xf   : > { %4462 = vmatprep.subr.bf16.mxu0 %v5007_v1  ;;  %4965 = vmatprep.subr.bf16.mxu1 %v5007_v1  ;;  %s4980_s22 = smul.u32 424, %s7047_s12  ;;  %v5015_v27 = vld [vmem:[%s6800_s1 + $0xb8] sm:$0xff]   ;;  %v5016_v36 = vld [vmem:[%s6800_s1 + $0x30] sm:$0xff]   ;;  %v5018_v45 = vld [vmem:[%s6800_s1 + $0x28] sm:$0xff]  }
  0x10   : > { %v5017_v38 = vld [vmem:[%s6800_s1 + $0xb0] sm:$0xff]   ;;  %v5019_v47 = vld [vmem:[%s6800_s1 + $0xa8] sm:$0xff]   ;;  %v5020_v56 = vld [vmem:[%s6800_s1 + $0x20] sm:$0xff]  }
  0x11   : > { %s5155_s25 = scalar_lea.vmem %s6799_s0, %s4980_s22  ;;  %v5021_v59 = vld [vmem:[%s6800_s1 + $0xa0] sm:$0xff]   ;;  %v5022_v63 = vld [vmem:[%s6800_s1 + $0x18] sm:$0xff]  }
  0x12   : > { %4463 = vmatpush3.bf16.msra.mxu0 %v5007_v1  ;;  %4973 = vmatpush3.bf16.msra.mxu1 %v5007_v1  ;;  %v3685_v4 = vld [vmem:[%s5155_s25 + $0x2] sm:$0xff]  ;;  %v3686_v5 = vld [vmem:[%s5155_s25 + $0xa] sm:$0xff]  ;;  %v5180_v13 = vld [vmem:[%s5155_s25 + $0x32] sm:$0xff] }
  0x13   : > { %4464 = vmatprep.subr.bf16.mxu0 %v5008_v2  ;;  %4966 = vmatprep.subr.bf16.mxu1 %v5008_v2  ;;  %v5163_v6 = vld [vmem:[%s5155_s25 + $0xa2] sm:$0xff]  ;;  %v361_v7 = vpack.c.bf16 %v3686_v5, %v3685_v4  ;;  %v5166_v8 = vld [vmem:[%s5155_s25 + $0xaa] sm:$0xff]  ;;  %v5188_v16 = vld [vmem:[%s5155_s25 + $0x3a] sm:$0xff] }
  0x14   : > { %6862 = vst [vmem:[#allocation2_spill] sm:$0xff] %v5163_v6  ;;  %6863 = vst [vmem:[#allocation3_spill] sm:$0xff] %v5166_v8  ;;  %v371_v9 = vpack.c.bf16 %v5166_v8, %v5163_v6  ;;  %v5177_v12 = vld [vmem:[%s5155_s25 + $0x2a] sm:$0xff]  ;;  %v5191_v17 = vld [vmem:[%s5155_s25 + $0x42] sm:$0xff]  ;;  %v364_v50 = vpack.c.bf16 %v5188_v16, %v5180_v13 }
  0x15   : > { %4476 = vmatprep.mubr.bf16.mxu0 %v361_v7  ;;  %v3687_v20 = vld [vmem:[%s5155_s25 + $0x12] sm:$0xff]  ;;  %v3688_v21 = vld [vmem:[%s5155_s25 + $0x1a] sm:$0xff]  ;;  %v5210_v25 = vld [vmem:[%s5155_s25 + $0x4a] sm:$0xff] }
  0x16   : > { %4465 = vmatpush3.bf16.msra.mxu0 %v5008_v2  ;;  %4974 = vmatpush3.bf16.msra.mxu1 %v5008_v2  ;;  %v5201_v22 = vld [vmem:[%s5155_s25 + $0xb2] sm:$0xff]  ;;  %v5204_v23 = vld [vmem:[%s5155_s25 + $0xba] sm:$0xff]  ;;  %v3689_v28 = vld [vmem:[%s5155_s25 + $0x22] sm:$0xff]  ;;  %v362_v31 = vpack.c.bf16 %v3688_v21, %v3687_v20  ;;  %v365_v54 = vpack.c.bf16 %v5210_v25, %v5191_v17 }
  0x17   : > { %4466 = vmatprep.subr.bf16.mxu0 %v5009_v3  ;;  %4967 = vmatprep.subr.bf16.mxu1 %v5009_v3  ;;  %6864 = vst [vmem:[#allocation4_spill] sm:$0xff] %v5201_v22  ;;  %6865 = vst [vmem:[#allocation5_spill] sm:$0xff] %v5204_v23  ;;  %v5213_v26 = vld [vmem:[%s5155_s25 + $0x52] sm:$0xff]  ;;  %v5222_v30 = vld [vmem:[%s5155_s25 + $0xc2] sm:$0xff]  ;;  %v372_v32 = vpack.c.bf16 %v5204_v23, %v5201_v22  ;;  %v363_v37 = vpack.c.bf16 %v5177_v12, %v3689_v28 }
  0x18   : > { %4496 = vmatprep.mubr.bf16.mxu1 %v371_v9  ;;  %6866 = vst [vmem:[#allocation6_spill] sm:$0xff] %v5222_v30  ;;  %v5227_v33 = vld [vmem:[%s5155_s25 + $0xca] sm:$0xff]  ;;  %v5230_v34 = vld [vmem:[%s5155_s25 + $0x5a] sm:$0xff]  ;;  %v5233_v35 = vld [vmem:[%s5155_s25 + $0x62] sm:$0xff] }
  0x19   : > { %6867 = vst [vmem:[#allocation7_spill] sm:$0xff] %v5227_v33  ;;  %6868 = vst [vmem:[#allocation8_spill] sm:$0xff] %v5230_v34  ;;  %v373_v40 = vpack.c.bf16 %v5227_v33, %v5222_v30  ;;  %v5247_v41 = vld [vmem:[%s5155_s25 + $0xd2] sm:$0xff]  ;;  %v5250_v42 = vld [vmem:[%s5155_s25 + $0xda] sm:$0xff]  ;;  %v366_v9 = vpack.c.bf16 %v5230_v34, %v5213_v26 }
  0x1a   : > { %4467 = vmatpush3.bf16.msra.mxu0 %v5009_v3  ;;  %4975 = vmatpush3.bf16.msra.mxu1 %v5009_v3  ;;  %6869 = vst [vmem:[#allocation9_spill] sm:$0xff] %v5247_v41  ;;  %6870 = vst [vmem:[#allocation10_spill] sm:$0xff] %v5250_v42  ;;  %v5253_v43 = vld [vmem:[%s5155_s25 + $0x6a] sm:$0xff]  ;;  %v5256_v44 = vld [vmem:[%s5155_s25 + $0x72] sm:$0xff]  ;;  %v374_v51 = vpack.c.bf16 %v5250_v42, %v5247_v41 }
  0x1b   : > { %4468 = vmatprep.subr.bf16.mxu0 %v5010_v10  ;;  %4968 = vmatprep.subr.bf16.mxu1 %v5010_v10  ;;  %6871 = vst [vmem:[#allocation11_spill] sm:$0xff] %v5253_v43  ;;  %6872 = vst [vmem:[#allocation12_spill] sm:$0xff] %v5256_v44  ;;  %v5267_v48 = vld [vmem:[%s5155_s25 + $0xe2] sm:$0xff]  ;;  %v5270_v49 = vld [vmem:[%s5155_s25 + $0xea] sm:$0xff] }
  0x1c   : > { %6873 = vst [vmem:[#allocation13_spill] sm:$0xff] %v5267_v48  ;;  %6874 = vst [vmem:[#allocation14_spill] sm:$0xff] %v5270_v49  ;;  %v5277_v52 = vld [vmem:[%s5155_s25 + $0x7a] sm:$0xff]  ;;  %v5280_v53 = vld [vmem:[%s5155_s25 + $0x82] sm:$0xff]  ;;  %v375_v55 = vpack.c.bf16 %v5270_v49, %v5267_v48 }
  0x1d   : > { %6875 = vst [vmem:[#allocation15_spill] sm:$0xff] %v5277_v52  ;;  %6876 = vst [vmem:[#allocation16_spill] sm:$0xff] %v5280_v53  ;;  %v5292_v58 = vld [vmem:[%s5155_s25 + $0xf2] sm:$0xff]  ;;  %v5298_v60 = vld [vmem:[%s5155_s25 + $0xfa] sm:$0xff] }
  0x1e   : > { %4469 = vmatpush3.bf16.msra.mxu0 %v5010_v10  ;;  %4976 = vmatpush3.bf16.msra.mxu1 %v5010_v10  ;;  %6877 = vst [vmem:[#allocation17_spill] sm:$0xff] %v5292_v58  ;;  %6878 = vst [vmem:[#allocation18_spill] sm:$0xff] %v5298_v60  ;;  %v5301_v61 = vld [vmem:[%s5155_s25 + $0x8a] sm:$0xff]  ;;  %v5304_v62 = vld [vmem:[%s5155_s25 + $0x92] sm:$0xff]  ;;  %v376_v10 = vpack.c.bf16 %v5298_v60, %v5292_v58 }
  0x1f   : > { %4470 = vmatprep.subr.bf16.mxu0 %v5011_v11  ;;  %4969 = vmatprep.subr.bf16.mxu1 %v5011_v11  ;;  %6879 = vst [vmem:[#allocation19_spill] sm:$0xff] %v5301_v61  ;;  %6880 = vst [vmem:[#allocation20_spill] sm:$0xff] %v5304_v62  ;;  %v5310_v0 = vld [vmem:[%s5155_s25 + $0x28] sm:$0xff]  ;;  %v5313_v1 = vld [vmem:[%s5155_s25 + $0x30] sm:$0xff] }
  0x20   : > { %v5023_v3 = vld [vmem:[%s6800_s1 + $0x98] sm:$0xff]   ;;  %v5321_v4 = vld [vmem:[%s5155_s25 + $0x102] sm:$0xff]  ;;  %v5326_v7 = vld [vmem:[%s5155_s25 + $0x10a] sm:$0xff] }
  0x21   : > { %6881 = vst [vmem:[#allocation21_spill] sm:$0xff] %v5321_v4  ;;  %6882 = vst [vmem:[#allocation22_spill] sm:$0xff] %v5326_v7  ;;  %v5341_v20 = vld [vmem:[%s5155_s25 + $0x9a] sm:$0xff]  ;;  %v5351_v28 = vld [vmem:[%s5155_s25 + $0x48] sm:$0xff] }
  0x22   : > { %4471 = vmatpush3.bf16.msra.mxu0 %v5011_v11  ;;  %4977 = vmatpush3.bf16.msra.mxu1 %v5011_v11  ;;  %v5333_v11 = vld [vmem:[%s5155_s25 + $0x38] sm:$0xff]  ;;  %6883 = vst [vmem:[#allocation23_spill] sm:$0xff] %v5341_v20  ;;  %v5411_v2 = vld [vmem:[%s5155_s25 + $0x80] sm:$0xff]  ;;  %v5414_v57 = vld [vmem:[%s5155_s25 + $0x88] sm:$0xff] }
  0x23   : > { %4472 = vmatprep.subr.bf16.mxu0 %v5012_v15  ;;  %4970 = vmatprep.subr.bf16.mxu1 %v5012_v15  ;;  %v5417_v46 = vld [vmem:[%s5155_s25 + $0x90] sm:$0xff]  ;;  %v5029_v29 = vld [vmem:[%s6800_s1 + $0x80] sm:$0xff]   ;;  %v244_v21 = vld [vmem:[%s5155_s25 + $0x8] sm:$0xff] }
  0x24   : > { %v5424_v39 = vld [vmem:[%s5155_s25 + $0x132] sm:$0xff]  ;;  %v5442_v19 = vld [vmem:[%s5155_s25 + $0xa0] sm:$0xff]  ;;  %v5476_v8 = vld [vmem:[%s5155_s25 + $0xc8] sm:$0xff] }
  0x25   : > { %6888 = vst [vmem:[#allocation28_spill] sm:$0xff] %v5424_v39  ;;  %v3757_v14 = vld [vmem:[%s5155_s25 + $0x4] sm:$0xff]  ;;  %v3758_v5 = vld [vmem:[%s5155_s25 + $0xc] sm:$0xff]  ;;  %v5470_v41 = vld [vmem:[%s5155_s25 + $0xb8] sm:$0xff] }
  0x26   : > { %4473 = vmatpush3.bf16.msra.mxu0 %v5012_v15  ;;  %4978 = vmatpush3.bf16.msra.mxu1 %v5012_v15  ;;  %v5336_v15 = vld [vmem:[%s5155_s25 + $0x40] sm:$0xff]  ;;  %v922_v33 = vpack.c.bf16 %v3758_v5, %v3757_v14  ;;  %v5479_v22 = vld [vmem:[%s5155_s25 + $0xd0] sm:$0xff]  ;;  %v5496_v42 = vld [vmem:[%s5155_s25 + $0xd8] sm:$0xff] }
  0x27   : > { %4474 = vmatprep.subr.bf16.mxu0 %v5013_v18  ;;  %4971 = vmatprep.subr.bf16.mxu1 %v5013_v18  ;;  %v5473_v30 = vld [vmem:[%s5155_s25 + $0xc0] sm:$0xff]  ;;  %v245_v5 = vld [vmem:[%s5155_s25 + $0x10] sm:$0xff]  ;;  %v5517_v6 = vld [vmem:[%s5155_s25 + $0xf8] sm:$0xff] }
  0x28   : > { %v247_v14 = vld [vmem:[%s5155_s25 + $0x20] sm:$0xff]  ;;  %v5034_v60 = vld [vmem:[%s6800_s1 + $0xe8] sm:$0xff]  }
  0x29   : > { %v5499_v48 = vld [vmem:[%s5155_s25 + $0xe0] sm:$0xff]  ;;  %v285_v49 = vpack.c.bf16 %v5310_v0, %v247_v14  ;;  %v5033_v14 = vld [vmem:[%s6800_s1 + $0x130] sm:$0xff]  }
  0x2a   : > { %4475 = vmatpush3.bf16.msra.mxu0 %v5013_v18  ;;  %4979 = vmatpush3.bf16.msra.mxu1 %v5013_v18  ;;  %v367_v18 = vpack.c.bf16 %v5253_v43, %v5233_v35  ;;  %v5597_v43 = vld [vmem:[%s5155_s25 + $0x64] sm:$0xff]  ;;  %v5602_v34 = vld [vmem:[%s5155_s25 + $0x6c] sm:$0xff] }
  0x2b   : > { %4516 = vmatprep.subr.bf16.mxu1 %v5014_v24  ;;  %4572 = vmatprep.subr.bf16.mxu0 %v5015_v27  ;;  %6891 = vst [vmem:[#allocation31_spill] sm:$0xff] %v5602_v34 }
  0x2d   : > { %4477 = vmatmul.mubr.bf16.vlgmr.msra.gmra.mxu0 %v362_v31  ;;  %4497 = vmatmul.mubr.bf16.vlgmr.msra.gmra.mxu1 %v372_v32  ;;  %v5354_v31 = vld [vmem:[%s5155_s25 + $0x50] sm:$0xff]  ;;  %v5408_v32 = vld [vmem:[%s5155_s25 + $0x78] sm:$0xff] }
  0x2e   : > { %4517 = vmatpush3.bf16.msra.mxu1 %v5014_v24  ;;  %4573 = vmatpush3.bf16.msra.mxu0 %v5015_v27  ;;  %v377_v24 = vpack.c.bf16 %v5326_v7, %v5321_v4  ;;  %v5024_v27 = vld [vmem:[%s6800_s1 + $0x10] sm:$0xff]   ;;  %v5561_v4 = vld [vmem:[%s5155_s25 + $0x118] sm:$0xff]  ;;  %v5037_v7 = vld [vmem:[%s6800_s1 + $0x120] sm:$0xff]  }
  0x2f   : > { %4518 = vmatprep.subr.bf16.mxu1 %v5016_v36  ;;  %4480 = vmatprep.mubr.bf16.mxu0 %v363_v37  ;;  %v5362_v37 = vld [vmem:[%s5155_s25 + $0x11a] sm:$0xff] }
  0x30   : > { %4500 = vmatprep.mubr.bf16.mxu1 %v373_v40  ;;  %4574 = vmatprep.subr.bf16.mxu0 %v5017_v38  ;;  %6885 = vst [vmem:[#allocation25_spill] sm:$0xff] %v5362_v37  ;;  %v5439_v40 = vld [vmem:[%s5155_s25 + $0x98] sm:$0xff] }
  0x31   : > { %6890 = vst [vmem:[#allocation30_spill] sm:$0xff] %v5439_v40 }
  0x32   : > { %4519 = vmatpush3.bf16.msra.mxu1 %v5016_v36  ;;  %4575 = vmatpush3.bf16.msra.mxu0 %v5017_v38  ;;  %v5359_v36 = vld [vmem:[%s5155_s25 + $0x112] sm:$0xff] }
  0x33   : > { %4520 = vmatprep.subr.bf16.mxu1 %v5018_v45  ;;  %4576 = vmatprep.subr.bf16.mxu0 %v5019_v47  ;;  %6884 = vst [vmem:[#allocation24_spill] sm:$0xff] %v5359_v36  ;;  %v5025_v38 = vld [vmem:[%s6800_s1 + $0x90] sm:$0xff]  }
  0x35   : > { %4481 = vmatmul.mubr.bf16.gmra.mxu0 %v364_v50  ;;  %4501 = vmatmul.mubr.bf16.gmra.mxu1 %v374_v51  ;;  %v5376_v50 = vld [vmem:[%s5155_s25 + $0x58] sm:$0xff]  ;;  %v5379_v51 = vld [vmem:[%s5155_s25 + $0x60] sm:$0xff] }
  0x36   : > { %4521 = vmatpush3.bf16.msra.mxu1 %v5018_v45  ;;  %4577 = vmatpush3.bf16.msra.mxu0 %v5019_v47  ;;  %v5026_v45 = vld [vmem:[%s6800_s1 + $0x8] sm:$0xff]  }
  0x37   : > { %4484 = vmatprep.mubr.bf16.mxu0 %v365_v54  ;;  %4504 = vmatprep.mubr.bf16.mxu1 %v375_v55  ;;  %v5373_v47 = vld [vmem:[%s5155_s25 + $0x122] sm:$0xff]  ;;  %v5384_v55 = vld [vmem:[%s5155_s25 + $0x12a] sm:$0xff] }
  0x38   : > { %4522 = vmatprep.subr.bf16.mxu1 %v5020_v56  ;;  %4578 = vmatprep.subr.bf16.mxu0 %v5021_v59  ;;  %6886 = vst [vmem:[#allocation26_spill] sm:$0xff] %v5373_v47  ;;  %6887 = vst [vmem:[#allocation27_spill] sm:$0xff] %v5384_v55  ;;  %v379_v54 = vpack.c.bf16 %v5384_v55, %v5373_v47  ;;  %v5631_v55 = vld [vmem:[%s5155_s25 + $0x7c] sm:$0xff] }
  0x39   : > { %6895 = vst [vmem:[#allocation35_spill] sm:$0xff] %v5631_v55  ;;  %v5044_v47 = vld [vmem:[%s6800_s1 + $0xc0] sm:$0xff]  }
  0x3a   : > { %4523 = vmatpush3.bf16.msra.mxu1 %v5020_v56  ;;  %4579 = vmatpush3.bf16.msra.mxu0 %v5021_v59  ;;  %v5387_v56 = vld [vmem:[%s5155_s25 + $0x68] sm:$0xff]  ;;  %v5390_v59 = vld [vmem:[%s5155_s25 + $0x70] sm:$0xff] }
  0x3b   : > { %4524 = vmatprep.subr.bf16.mxu1 %v5022_v63  ;;  %4580 = vmatprep.subr.bf16.mxu0 %v5023_v3 }
  0x3d   : > { %4485 = vmatmul.mubr.bf16.gmra.mxu0 %v366_v9  ;;  %4505 = vmatmul.mubr.bf16.gmra.mxu1 %v376_v10  ;;  %v5027_v9 = vld [vmem:[%s6800_s1 + $0x88] sm:$0xff]   ;;  %v368_v10 = vpack.c.bf16 %v5277_v52, %v5256_v44  ;;  %v5591_v52 = vld [vmem:[%s5155_s25 + $0x5c] sm:$0xff]  ;;  %v5628_v44 = vld [vmem:[%s5155_s25 + $0x74] sm:$0xff] }
  0x3e   : > { %4525 = vmatpush3.bf16.msra.mxu1 %v5022_v63  ;;  %4488 = vmatprep.mubr.bf16.mxu0 %v367_v18  ;;  %v378_v18 = vpack.c.bf16 %v5362_v37, %v5359_v36  ;;  %v5427_v63 = vld [vmem:[%s5155_s25 + $0x13a] sm:$0xff]  ;;  %v5583_v36 = vld [vmem:[%s5155_s25 + $0x128] sm:$0xff]  ;;  %6894 = vst [vmem:[#allocation34_spill] sm:$0xff] %v5628_v44 }
  0x3f   : > { %4508 = vmatprep.mubr.bf16.mxu1 %v377_v24  ;;  %4581 = vmatpush3.bf16.msra.mxu0 %v5023_v3  ;;  %v369_v24 = vpack.c.bf16 %v5301_v61, %v5280_v53  ;;  %6889 = vst [vmem:[#allocation29_spill] sm:$0xff] %v5427_v63  ;;  %v243_v3 = vld [vmem:[%s5155_s25] sm:$0xff]  ;;  %v380_v23 = vpack.c.bf16 %v5427_v63, %v5424_v39  ;;  %v5594_v53 = vld [vmem:[%s5155_s25 + $0x130] sm:$0xff] }
  0x40   : > { %4526 = vmatprep.subr.bf16.mxu1 %v5024_v27  ;;  %4582 = vmatprep.subr.bf16.mxu0 %v5025_v38  ;;  %v3761_v63 = vld [vmem:[%s5155_s25 + $0x24] sm:$0xff]  ;;  %v5041_v39 = vld [vmem:[%s6800_s1 + $0x110] sm:$0xff]   ;;  %v5666_v37 = vld [vmem:[%s5155_s25 + $0x9c] sm:$0xff] }
  0x41   : > { %v5520_v61 = vld [vmem:[%s5155_s25 + $0x100] sm:$0xff]  ;;  %6901 = vst [vmem:[#allocation41_spill] sm:$0xff] %v5666_v37 }
  0x42   : > { %4527 = vmatpush3.bf16.msra.mxu1 %v5024_v27  ;;  %v283_v27 = vpack.c.bf16 %v244_v21, %v243_v3  ;;  %v246_v21 = vld [vmem:[%s5155_s25 + $0x18] sm:$0xff] }
  0x43   : > { %4583 = vmatpush3.bf16.msra.mxu0 %v5025_v38  ;;  %4528 = vmatprep.subr.bf16.mxu1 %v5026_v45  ;;  %v5028_v38 = vld [vmem:[%s6800_s1] sm:$0xff]   ;;  %v3759_v3 = vld [vmem:[%s5155_s25 + $0x14] sm:$0xff] }
  0x44   : > { %4584 = vmatprep.subr.bf16.mxu0 %v5027_v9 }
  0x45   : > { %4489 = vmatmul.mubr.bf16.gmra.mxu0 %v368_v10  ;;  %4509 = vmatmul.mubr.bf16.gmra.mxu1 %v378_v18  ;;  %v5030_v18 = vld [vmem:[%s6800_s1 + $0xf8] sm:$0xff]  }
  0x46   : > { %4492 = vmatprep.mubr.bf16.mxu0 %v369_v24  ;;  %4512 = vmatprep.mubr.bf16.mxu1 %v379_v54  ;;  %v5455_v54 = vld [vmem:[%s5155_s25 + $0xa8] sm:$0xff]  ;;  %v5458_v24 = vld [vmem:[%s5155_s25 + $0xb0] sm:$0xff]  ;;  %v5031_v10 = vld [vmem:[%s6800_s1 + $0x138] sm:$0xff]  }
  0x47   : > { %4529 = vmatpush3.bf16.msra.mxu1 %v5026_v45  ;;  %4585 = vmatpush3.bf16.msra.mxu0 %v5027_v9  ;;  %v370_v9 = vpack.c.bf16 %v5341_v20, %v5304_v62  ;;  %v5502_v20 = vld [vmem:[%s5155_s25 + $0x2c] sm:$0xff]  ;;  %v5525_v62 = vld [vmem:[%s5155_s25 + $0x34] sm:$0xff] }
  0x48   : > { %4530 = vmatprep.subr.bf16.mxu1 %v5028_v38  ;;  %4586 = vmatprep.subr.bf16.mxu0 %v5029_v29  ;;  %v924_v58 = vpack.c.bf16 %v5502_v20, %v3761_v63 }
  0x4b   : > { %4531 = vmatpush3.bf16.msra.mxu1 %v5028_v38  ;;  %4587 = vmatpush3.bf16.msra.mxu0 %v5029_v29  ;;  %v3760_v38 = vld [vmem:[%s5155_s25 + $0x1c] sm:$0xff]  ;;  %v5548_v29 = vld [vmem:[%s5155_s25 + $0x110] sm:$0xff] }
  0x4c   : > { %4628 = vmatprep.subr.bf16.mxu1 %v5030_v18  ;;  %4684 = vmatprep.subr.bf16.mxu0 %v5031_v10  ;;  %v923_v45 = vpack.c.bf16 %v3760_v38, %v3759_v3  ;;  %v5539_v3 = vld [vmem:[%s5155_s25 + $0x44] sm:$0xff]  ;;  %v5542_v38 = vld [vmem:[%s5155_s25 + $0x4c] sm:$0xff] }
  0x4d   : > { %4493 = vmatmul.mubr.bf16.gmra.mxu0 %v370_v9  ;;  %4513 = vmatmul.mubr.bf16.gmra.mxu1 %v380_v23  ;;  %v5505_v9 = vld [vmem:[%s5155_s25 + $0xe8] sm:$0xff]  ;;  %v5508_v23 = vld [vmem:[%s5155_s25 + $0xf0] sm:$0xff]  ;;  %v926_v63 = vpack.c.bf16 %v5542_v38, %v5539_v3 }
  0x4e   : > { %4532 = vmatprep.mubr.bf16.mxu1 %v283_v27  ;;  %4588 = vmatprep.mubr.bf16.mxu0 %v922_v33  ;;  %v284_v27 = vpack.c.bf16 %v246_v21, %v245_v5  ;;  %v5528_v5 = vld [vmem:[%s5155_s25 + $0x3c] sm:$0xff]  ;;  %v5032_v21 = vld [vmem:[%s6800_s1 + $0xf0] sm:$0xff]   ;;  %v5545_v33 = vld [vmem:[%s5155_s25 + $0x108] sm:$0xff] }
  0x55   : > { %4533 = vmatmul.mubr.bf16.vlgmr.msra.gmra.mxu1 %v284_v27  ;;  %4589 = vmatmul.mubr.bf16.vlgmr.msra.gmra.mxu0 %v923_v45  ;;  %v5035_v27 = vld [vmem:[%s6800_s1 + $0x128] sm:$0xff]   ;;  %v287_v45 = vpack.c.bf16 %v5351_v28, %v5336_v15 }
  0x56   : > { %4629 = vmatpush3.bf16.msra.mxu1 %v5030_v18  ;;  %4685 = vmatpush3.bf16.msra.mxu0 %v5031_v10  ;;  %v5564_v10 = vld [vmem:[%s5155_s25 + $0x120] sm:$0xff] }
  0x57   : > { %4536 = vmatprep.mubr.bf16.mxu1 %v285_v49  ;;  %4592 = vmatprep.mubr.bf16.mxu0 %v924_v58  ;;  %v286_v49 = vpack.c.bf16 %v5333_v11, %v5313_v1  ;;  %v925_v58 = vpack.c.bf16 %v5528_v5, %v5525_v62  ;;  %v5036_v18 = vld [vmem:[%s6800_s1 + $0xe0] sm:$0xff]  }
  0x58   : > { %4630 = vmatprep.subr.bf16.mxu1 %v5032_v21  ;;  %4686 = vmatprep.subr.bf16.mxu0 %v5033_v14 }
  0x5a   : > { %4631 = vmatpush3.bf16.msra.mxu1 %v5032_v21  ;;  %4687 = vmatpush3.bf16.msra.mxu0 %v5033_v14  ;;  %v5588_v14 = vld [vmem:[%s5155_s25 + $0x54] sm:$0xff] }
  0x5b   : > { %4632 = vmatprep.subr.bf16.mxu1 %v5034_v60  ;;  %4688 = vmatprep.subr.bf16.mxu0 %v5035_v27  ;;  %v5040_v21 = vld [vmem:[%s6800_s1 + $0xd0] sm:$0xff]  }
  0x5d   : > { %4537 = vmatmul.mubr.bf16.gmra.mxu1 %v286_v49  ;;  %4593 = vmatmul.mubr.bf16.gmra.mxu0 %v925_v58  ;;  %v5038_v49 = vld [vmem:[%s6800_s1 + $0xd8] sm:$0xff]   ;;  %v927_v58 = vpack.c.bf16 %v5591_v52, %v5588_v14 }
  0x5e   : > { %4540 = vmatprep.mubr.bf16.mxu1 %v287_v45  ;;  %4596 = vmatprep.mubr.bf16.mxu0 %v926_v63  ;;  %v5039_v63 = vld [vmem:[%s6800_s1 + $0x118] sm:$0xff]   ;;  %v5614_v45 = vpack.c.bf16 %v5376_v50, %v5354_v31 }
  0x5f   : > { %4633 = vmatpush3.bf16.msra.mxu1 %v5034_v60  ;;  %4689 = vmatpush3.bf16.msra.mxu0 %v5035_v27  ;;  %v5620_v60 = vpack.c.bf16 %v5387_v56, %v5379_v51  ;;  %v928_v27 = vpack.c.bf16 %v5602_v34, %v5597_v43  ;;  %v5638_v34 = vld [vmem:[%s5155_s25 + $0x84] sm:$0xff] }
  0x60   : > { %4634 = vmatprep.subr.bf16.mxu1 %v5036_v18  ;;  %4690 = vmatprep.subr.bf16.mxu0 %v5037_v7  ;;  %6892 = vst [vmem:[#allocation32_spill] sm:$0xff] %v5614_v45  ;;  %6896 = vst [vmem:[#allocation36_spill] sm:$0xff] %v5638_v34 }
  0x61   : > { %6893 = vst [vmem:[#allocation33_spill] sm:$0xff] %v5620_v60 }
  0x63   : > { %4635 = vmatpush3.bf16.msra.mxu1 %v5036_v18  ;;  %4691 = vmatpush3.bf16.msra.mxu0 %v5037_v7  ;;  %v5642_v7 = vld [vmem:[%s5155_s25 + $0x8c] sm:$0xff] }
  0x64   : > { %4636 = vmatprep.subr.bf16.mxu1 %v5038_v49  ;;  %4692 = vmatprep.subr.bf16.mxu0 %v5039_v63  ;;  %6897 = vst [vmem:[#allocation37_spill] sm:$0xff] %v5642_v7  ;;  %v5042_v18 = vld [vmem:[%s6800_s1 + $0xc8] sm:$0xff]  }
  0x65   : > { %4541 = vmatmul.mubr.bf16.gmra.mxu1 %v5614_v45  ;;  %4597 = vmatmul.mubr.bf16.gmra.mxu0 %v927_v58  ;;  %v5043_v58 = vld [vmem:[%s6800_s1 + $0x108] sm:$0xff]   ;;  %v5663_v45 = vld [vmem:[%s5155_s25 + $0x94] sm:$0xff] }
  0x66   : > { %4544 = vmatprep.mubr.bf16.mxu1 %v5620_v60  ;;  %4600 = vmatprep.mubr.bf16.mxu0 %v928_v27  ;;  %v5652_v60 = vpack.c.bf16 %v5408_v32, %v5390_v59  ;;  %v930_v27 = vpack.c.bf16 %v5642_v7, %v5638_v34  ;;  %6900 = vst [vmem:[#allocation40_spill] sm:$0xff] %v5663_v45  ;;  %v5676_v7 = vld [vmem:[%s5155_s25 + $0xa4] sm:$0xff]  ;;  %v5690_v34 = vld [vmem:[%s6800_s1 + $0x1b8] sm:$0xff]  }
  0x67   : > { %4637 = vmatpush3.bf16.msra.mxu1 %v5038_v49  ;;  %4693 = vmatpush3.bf16.msra.mxu0 %v5039_v63  ;;  %v929_v49 = vpack.c.bf16 %v5631_v55, %v5628_v44  ;;  %v5658_v63 = vpack.c.bf16 %v5414_v57, %v5411_v2  ;;  %v5045_v55 = vld [vmem:[%s6800_s1 + $0x100] sm:$0xff]   ;;  %6902 = vst [vmem:[#allocation42_spill] sm:$0xff] %v5676_v7 }
  0x68   : > { %4638 = vmatprep.subr.bf16.mxu1 %v5040_v21  ;;  %4694 = vmatprep.subr.bf16.mxu0 %v5041_v39  ;;  %6898 = vst [vmem:[#allocation38_spill] sm:$0xff] %v5652_v60 }
  0x69   : > { %6899 = vst [vmem:[#allocation39_spill] sm:$0xff] %v5658_v63 }
  0x6b   : > { %4639 = vmatpush3.bf16.msra.mxu1 %v5040_v21  ;;  %4695 = vmatpush3.bf16.msra.mxu0 %v5041_v39  ;;  %v5679_v39 = vld [vmem:[%s5155_s25 + $0xac] sm:$0xff]  ;;  %v5685_v21 = vld [vmem:[%s6800_s1 + $0x178] sm:$0xff]  }
  0x6c   : > { %4640 = vmatprep.subr.bf16.mxu1 %v5042_v18  ;;  %4696 = vmatprep.subr.bf16.mxu0 %v5043_v58  ;;  %6903 = vst [vmem:[#allocation43_spill] sm:$0xff] %v5679_v39  ;;  %v932_v44 = vpack.c.bf16 %v5679_v39, %v5676_v7  ;;  %v5718_v39 = vld [vmem:[%s5155_s25 + $0xc4] sm:$0xff]  ;;  %v3786_v7 = vld [vmem:[%s5155_s25 + $0xec] sm:$0xff] }
  0x6d   : > { %4545 = vmatmul.mubr.bf16.gmra.mxu1 %v5652_v60  ;;  %4601 = vmatmul.mubr.bf16.gmra.mxu0 %v929_v49  ;;  %v5694_v49 = vpack.c.bf16 %v5439_v40, %v5417_v46  ;;  %v5709_v60 = vld [vmem:[%s5155_s25 + $0xb4] sm:$0xff]  ;;  %v5712_v40 = vld [vmem:[%s5155_s25 + $0xbc] sm:$0xff]  ;;  %6907 = vst [vmem:[#allocation47_spill] sm:$0xff] %v5718_v39 }
  0x6e   : > { %4548 = vmatprep.mubr.bf16.mxu1 %v5658_v63  ;;  %4604 = vmatprep.mubr.bf16.mxu0 %v930_v27  ;;  %v931_v27 = vpack.c.bf16 %v5666_v37, %v5663_v45  ;;  %v5700_v63 = vpack.c.bf16 %v5455_v54, %v5442_v19  ;;  %6905 = vst [vmem:[#allocation45_spill] sm:$0xff] %v5709_v60  ;;  %6906 = vst [vmem:[#allocation46_spill] sm:$0xff] %v5712_v40  ;;  %v3788_v37 = vld [vmem:[%s5155_s25 + $0xfc] sm:$0xff] }
  0x6f   : > { %4641 = vmatpush3.bf16.msra.mxu1 %v5042_v18  ;;  %4697 = vmatpush3.bf16.msra.mxu0 %v5043_v58  ;;  %v933_v58 = vpack.c.bf16 %v5712_v40, %v5709_v60  ;;  %v5743_v40 = vld [vmem:[%s5155_s25 + $0xd4] sm:$0xff]  ;;  %v5746_v60 = vld [vmem:[%s5155_s25 + $0xdc] sm:$0xff] }
  0x70   : > { %4642 = vmatprep.subr.bf16.mxu1 %v5044_v47  ;;  %4698 = vmatprep.subr.bf16.mxu0 %v5045_v55  ;;  %6904 = vst [vmem:[#allocation44_spill] sm:$0xff] %v5700_v63  ;;  %6911 = vst [vmem:[#allocation51_spill] sm:$0xff] %v5743_v40 }
  0x71   : > { %6912 = vst [vmem:[#allocation52_spill] sm:$0xff] %v5746_v60 }
  0x73   : > { %4643 = vmatpush3.bf16.msra.mxu1 %v5044_v47  ;;  %4699 = vmatpush3.bf16.msra.mxu0 %v5045_v55  ;;  %v5722_v47 = vld [vmem:[%s5155_s25 + $0xcc] sm:$0xff]  ;;  %v5726_v55 = vpack.c.bf16 %v5470_v41, %v5458_v24 }
  0x74   : > { %4740 = vmatprep.subr.bf16.mxu1 %v5685_v21  ;;  %4796 = vmatprep.subr.bf16.mxu0 %v5690_v34  ;;  %6908 = vst [vmem:[#allocation48_spill] sm:$0xff] %v5722_v47  ;;  %v934_v18 = vpack.c.bf16 %v5722_v47, %v5718_v39  ;;  %v5749_v47 = vld [vmem:[%s5155_s25 + $0xe4] sm:$0xff]  ;;  %v5760_v39 = vpack.c.bf16 %v5505_v9, %v5499_v48 }
  0x75   : > { %4549 = vmatmul.mubr.bf16.gmra.mxu1 %v5694_v49  ;;  %4605 = vmatmul.mubr.bf16.gmra.mxu0 %v931_v27  ;;  %6909 = vst [vmem:[#allocation49_spill] sm:$0xff] %v5726_v55  ;;  %v5732_v27 = vpack.c.bf16 %v5476_v8, %v5473_v30  ;;  %6913 = vst [vmem:[#allocation53_spill] sm:$0xff] %v5749_v47 }
  0x76   : > { %4552 = vmatprep.mubr.bf16.mxu1 %v5700_v63  ;;  %4608 = vmatprep.mubr.bf16.mxu0 %v932_v44  ;;  %v5754_v44 = vpack.c.bf16 %v5496_v42, %v5479_v22  ;;  %6915 = vst [vmem:[#allocation55_spill] sm:$0xff] %v5760_v39  ;;  %v3794_v63 = vld [vmem:[%s5155_s25 + $0x12c] sm:$0xff] }
  0x77   : > { %6910 = vst [vmem:[#allocation50_spill] sm:$0xff] %v5732_v27 }
  0x78   : > { %6914 = vst [vmem:[#allocation54_spill] sm:$0xff] %v5754_v44 }
  0x7d   : > { %4553 = vmatmul.mubr.bf16.gmra.mxu1 %v5726_v55  ;;  %4609 = vmatmul.mubr.bf16.gmra.mxu0 %v933_v58  ;;  %v935_v58 = vpack.c.bf16 %v5746_v60, %v5743_v40  ;;  %v5768_v55 = vld [vmem:[%s5155_s25 + $0x104] sm:$0xff]  ;;  %v3790_v60 = vld [vmem:[%s5155_s25 + $0x10c] sm:$0xff]  ;;  %v5773_v40 = vpack.c.bf16 %v5517_v6, %v5508_v23 }
  0x7e   : > { %4556 = vmatprep.mubr.bf16.mxu1 %v5732_v27  ;;  %4612 = vmatprep.mubr.bf16.mxu0 %v934_v18  ;;  %v936_v18 = vpack.c.bf16 %v3786_v7, %v5749_v47  ;;  %v3787_v27 = vld [vmem:[%s5155_s25 + $0xf4] sm:$0xff]  ;;  %6916 = vst [vmem:[#allocation56_spill] sm:$0xff] %v5768_v55  ;;  %v5777_v47 = vpack.c.bf16 %v5545_v33, %v5520_v61 }
  0x7f   : > { %6917 = vst [vmem:[#allocation57_spill] sm:$0xff] %v5773_v40  ;;  %v937_v7 = vpack.c.bf16 %v3788_v37, %v3787_v27  ;;  %v5788_v37 = vpack.c.bf16 %v5561_v4, %v5548_v29 }
  0x80   : > { %6918 = vst [vmem:[#allocation58_spill] sm:$0xff] %v5777_v47 }
  0x85   : > { %4557 = vmatmul.mubr.bf16.gmra.mxu1 %v5754_v44  ;;  %4613 = vmatmul.mubr.bf16.gmra.mxu0 %v935_v58  ;;  %v938_v58 = vpack.c.bf16 %v3790_v60, %v5768_v55  ;;  %v3793_v44 = vld [vmem:[%s5155_s25 + $0x124] sm:$0xff]  ;;  %v5792_v60 = vpack.c.bf16 %v5583_v36, %v5564_v10 }
  0x86   : > { %4560 = vmatprep.mubr.bf16.mxu1 %v5760_v39  ;;  %4616 = vmatprep.mubr.bf16.mxu0 %v936_v18  ;;  %v3791_v18 = vld [vmem:[%s5155_s25 + $0x114] sm:$0xff]  ;;  %v3792_v39 = vld [vmem:[%s5155_s25 + $0x11c] sm:$0xff]  ;;  %v940_v55 = vpack.c.bf16 %v3794_v63, %v3793_v44  ;;  %v6920_v63 = vpack.c.bf16 %v5180_v13, %v5177_v12  ;;  %v6923_v12 = vpack.c.bf16 %v5354_v31, %v5351_v28  ;;  %v6930_v31 = vld [vmem:[#allocation11_spill] sm:$0xff] }
  0x87   : > { %v939_v27 = vpack.c.bf16 %v3792_v39, %v3791_v18  ;;  %v6919_v39 = vpack.c.bf16 %v5313_v1, %v5310_v0  ;;  %v5049_v44 = vld [vmem:[%s6800_s1 + $0x1b0] sm:$0xff]   ;;  %v6922_v0 = vpack.c.bf16 %v5191_v17, %v5188_v16  ;;  %v6924_v13 = vpack.c.bf16 %v5213_v26, %v5210_v25  ;;  %v5050_v1 = vld [vmem:[%s6800_s1 + $0x168] sm:$0xff]   ;;  %v5052_v17 = vld [vmem:[%s6800_s1 + $0x160] sm:$0xff]  }
  0x88   : > { %v5051_v16 = vld [vmem:[%s6800_s1 + $0x1a8] sm:$0xff]   ;;  %v5053_v25 = vld [vmem:[%s6800_s1 + $0x1a0] sm:$0xff]   ;;  %v6925_v26 = vpack.c.bf16 %v5379_v51, %v5376_v50  ;;  %v6929_v28 = vld [vmem:[#allocation12_spill] sm:$0xff] }
  0x89   : > { %v5054_v50 = vld [vmem:[%s6800_s1 + $0x158] sm:$0xff]   ;;  %v5056_v51 = vld [vmem:[%s6800_s1 + $0x150] sm:$0xff]  }
  0x8d   : > { %4561 = vmatmul.mubr.bf16.gmra.mxu1 %v5773_v40  ;;  %4617 = vmatmul.mubr.bf16.gmra.mxu0 %v937_v7  ;;  %v5797_v7 = vld [vmem:[%s5155_s25 + $0x138] sm:$0xff] }
  0x8e   : > { %4564 = vmatprep.mubr.bf16.mxu1 %v5777_v47  ;;  %4620 = vmatprep.mubr.bf16.mxu0 %v938_v58  ;;  %v3795_v58 = vld [vmem:[%s5155_s25 + $0x134] sm:$0xff]  ;;  %v3796_v47 = vld [vmem:[%s5155_s25 + $0x13c] sm:$0xff]  ;;  %v302_v40 = vpack.c.bf16 %v5797_v7, %v5594_v53 }
  0x8f   : > { %v941_v45 = vpack.c.bf16 %v3796_v47, %v3795_v58  ;;  %v6934_v47 = vld [vmem:[#allocation15_spill] sm:$0xff]  ;;  %v6937_v58 = vld [vmem:[#allocation20_spill] sm:$0xff] }
  0x95   : > { %4565 = vmatmul.mubr.bf16.gmra.mxu1 %v5788_v37  ;;  %4621 = vmatmul.mubr.bf16.gmra.mxu0 %v939_v27  ;;  %v6936_v27 = vpack.c.bf16 %v5417_v46, %v5414_v57  ;;  %v5060_v46 = vld [vmem:[%s6800_s1 + $0x140] sm:$0xff]  }
  0x96   : > { %4568 = vmatprep.mubr.bf16.mxu1 %v5792_v60  ;;  %4624 = vmatprep.mubr.bf16.mxu0 %v940_v55  ;;  %v5048_v55 = vld [vmem:[%s6800_s1 + $0x170] sm:$0xff]   ;;  %v5061_v57 = vld [vmem:[%s6800_s1 + $0x180] sm:$0xff]  }
  0x9d   : > { %4569 = vmatmul.mubr.bf16.gmra.mxu1 %v302_v40  ;;  %4625 = vmatmul.mubr.bf16.gmra.mxu0 %v941_v45  ;;  %v6921_v40 = vpack.c.bf16 %v5336_v15, %v5333_v11  ;;  %v6928_v15 = vpack.c.bf16 %v5390_v59, %v5387_v56  ;;  %v6931_v45 = vpack.c.bf16 %v6929_v28, %v6930_v31  ;;  %v5057_v56 = vld [vmem:[%s6800_s1 + $0x190] sm:$0xff]   ;;  %v6955_v28 = vld [vmem:[#allocation7_spill] sm:$0xff] }
  0x9e   : > { %4644 = vmatprep.mubr.bf16.mxu1 %v6919_v39  ;;  %4700 = vmatprep.mubr.bf16.mxu0 %v6920_v63  ;;  %v6932_v59 = vpack.c.bf16 %v5411_v2, %v5408_v32  ;;  %v6938_v39 = vld [vmem:[#allocation19_spill] sm:$0xff] }
  0x9f   : > { %v6939_v63 = vpack.c.bf16 %v6937_v58, %v6938_v39  ;;  %v5058_v2 = vld [vmem:[%s6800_s1 + $0x148] sm:$0xff]   ;;  %v6975_v58 = vld [vmem:[#allocation25_spill] sm:$0xff]  ;;  %v6978_v39 = vld [vmem:[#allocation28_spill] sm:$0xff] }
  0xa0   : > { %v5059_v32 = vld [vmem:[%s6800_s1 + $0x188] sm:$0xff]  }
  0xa5   : > { %4645 = vmatmul.mubr.bf16.vlgmr.msra.gmra.mxu1 %v6921_v40  ;;  %4701 = vmatmul.mubr.bf16.vlgmr.msra.gmra.mxu0 %v6922_v0  ;;  %v6942_v40 = vld [vmem:[#allocation2_spill] sm:$0xff]  ;;  %v6943_v0 = vld [vmem:[#allocation23_spill] sm:$0xff] }
  0xa6   : > { %4741 = vmatpush3.bf16.msra.mxu1 %v5685_v21  ;;  %4797 = vmatpush3.bf16.msra.mxu0 %v5690_v34  ;;  %v6926_v34 = vld [vmem:[#allocation8_spill] sm:$0xff] }
  0xa7   : > { %4648 = vmatprep.mubr.bf16.mxu1 %v6923_v12  ;;  %4704 = vmatprep.mubr.bf16.mxu0 %v6924_v13  ;;  %v6927_v11 = vpack.c.bf16 %v5233_v35, %v6926_v34  ;;  %v5055_v35 = vld [vmem:[%s6800_s1 + $0x198] sm:$0xff]   ;;  %v6933_v21 = vld [vmem:[#allocation16_spill] sm:$0xff]  ;;  %v6944_v12 = vpack.c.bf16 %v6942_v40, %v6943_v0  ;;  %v6945_v13 = vpack.c.bf16 %v5458_v24, %v5455_v54  ;;  %v6950_v24 = vld [vmem:[#allocation6_spill] sm:$0xff] }
  0xa8   : > { %4742 = vmatprep.subr.bf16.mxu1 %v5048_v55  ;;  %4798 = vmatprep.subr.bf16.mxu0 %v5049_v44  ;;  %v6935_v18 = vpack.c.bf16 %v6933_v21, %v6934_v47  ;;  %v6949_v54 = vpack.c.bf16 %v5473_v30, %v5470_v41  ;;  %v6958_v30 = vld [vmem:[#allocation13_spill] sm:$0xff]  ;;  %v6959_v41 = vld [vmem:[#allocation10_spill] sm:$0xff]  ;;  %v6969_v21 = vpack.c.bf16 %v5548_v29, %v5545_v33  ;;  %v6970_v47 = vld [vmem:[#allocation24_spill] sm:$0xff] }
  0xa9   : > { %v6979_v29 = vld [vmem:[#allocation27_spill] sm:$0xff]  ;;  %v5973_v40 = vld [vmem:[%s5155_s25 + $0x158] sm:$0xff]  ;;  %v5976_v0 = vld [vmem:[%s5155_s25 + $0x160] sm:$0xff] }
  0xaa   : > { %4743 = vmatpush3.bf16.msra.mxu1 %v5048_v55  ;;  %4799 = vmatpush3.bf16.msra.mxu0 %v5049_v44  ;;  %v6940_v55 = vld [vmem:[#allocation30_spill] sm:$0xff]  ;;  %v6980_v33 = vpack.c.bf16 %v6978_v39, %v6979_v29  ;;  %v6993_v39 = vld [vmem:[#allocation36_spill] sm:$0xff] }
  0xab   : > { %4744 = vmatprep.subr.bf16.mxu1 %v5050_v1  ;;  %4800 = vmatprep.subr.bf16.mxu0 %v5051_v16  ;;  %v6941_v44 = vpack.c.bf16 %v5442_v19, %v6940_v55  ;;  %v5062_v19 = vld [vmem:[%s6800_s1 + $0x1f8] sm:$0xff]  }
  0xad   : > { %4649 = vmatmul.mubr.bf16.gmra.mxu1 %v6925_v26  ;;  %4705 = vmatmul.mubr.bf16.gmra.mxu0 %v6927_v11  ;;  %v6951_v26 = vld [vmem:[#allocation5_spill] sm:$0xff]  ;;  %v6953_v11 = vpack.c.bf16 %v5479_v22, %v5476_v8  ;;  %v6961_v8 = vpack.c.bf16 %v5508_v23, %v5505_v9  ;;  %v6971_v9 = vld [vmem:[#allocation22_spill] sm:$0xff] }
  0xae   : > { %4652 = vmatprep.mubr.bf16.mxu1 %v6928_v15  ;;  %4708 = vmatprep.mubr.bf16.mxu0 %v6931_v45  ;;  %v6952_v34 = vpack.c.bf16 %v6950_v24, %v6951_v26  ;;  %v6954_v15 = vld [vmem:[#allocation9_spill] sm:$0xff]  ;;  %v6957_v45 = vpack.c.bf16 %v5499_v48, %v5496_v42  ;;  %v6967_v48 = vld [vmem:[#allocation18_spill] sm:$0xff]  ;;  %v6972_v23 = vpack.c.bf16 %v6970_v47, %v6971_v9  ;;  %v6983_v24 = vld [vmem:[#allocation32_spill] sm:$0xff] }
  0xaf   : > { %4745 = vmatpush3.bf16.msra.mxu1 %v5050_v1  ;;  %4801 = vmatpush3.bf16.msra.mxu0 %v5051_v16  ;;  %v6946_v1 = vld [vmem:[#allocation4_spill] sm:$0xff]  ;;  %v6947_v16 = vld [vmem:[#allocation3_spill] sm:$0xff]  ;;  %v6956_v31 = vpack.c.bf16 %v6954_v15, %v6955_v28  ;;  %v6962_v22 = vld [vmem:[#allocation17_spill] sm:$0xff] }
  0xb0   : > { %4746 = vmatprep.subr.bf16.mxu1 %v5052_v17  ;;  %4802 = vmatprep.subr.bf16.mxu0 %v5053_v25  ;;  %v6966_v42 = vld [vmem:[#allocation21_spill] sm:$0xff] }
  0xb3   : > { %4747 = vmatpush3.bf16.msra.mxu1 %v5052_v17  ;;  %4803 = vmatpush3.bf16.msra.mxu0 %v5053_v25  ;;  %v6948_v17 = vpack.c.bf16 %v6946_v1, %v6947_v16  ;;  %v5063_v25 = vld [vmem:[%s6800_s1 + $0x238] sm:$0xff]   ;;  %v1301_v1 = vpack.c.bf16 %v5976_v0, %v5973_v40 }
  0xb4   : > { %4748 = vmatprep.subr.bf16.mxu1 %v5054_v50  ;;  %4804 = vmatprep.subr.bf16.mxu0 %v5055_v35 }
  0xb5   : > { %4653 = vmatmul.mubr.bf16.gmra.mxu1 %v6932_v59  ;;  %4709 = vmatmul.mubr.bf16.gmra.mxu0 %v6935_v18  ;;  %v6968_v59 = vpack.c.bf16 %v6966_v42, %v6967_v48  ;;  %v6973_v18 = vpack.c.bf16 %v5564_v10, %v5561_v4  ;;  %v5960_v4 = vld [vmem:[%s5155_s25 + $0x148] sm:$0xff]  ;;  %v5963_v10 = vld [vmem:[%s5155_s25 + $0x150] sm:$0xff] }
  0xb6   : > { %4656 = vmatprep.mubr.bf16.mxu1 %v6936_v27  ;;  %4712 = vmatprep.mubr.bf16.mxu0 %v6939_v63  ;;  %v6974_v27 = vld [vmem:[#allocation26_spill] sm:$0xff]  ;;  %v1300_v55 = vpack.c.bf16 %v5963_v10, %v5960_v4 }
  0xb7   : > { %4749 = vmatpush3.bf16.msra.mxu1 %v5054_v50  ;;  %4805 = vmatpush3.bf16.msra.mxu0 %v5055_v35  ;;  %v6960_v50 = vpack.c.bf16 %v6958_v30, %v6959_v41  ;;  %v6963_v35 = vld [vmem:[#allocation14_spill] sm:$0xff]  ;;  %v6984_v41 = vpack.c.bf16 %v5539_v3, %v5528_v5  ;;  %v5067_v5 = vld [vmem:[%s6800_s1 + $0x228] sm:$0xff]  }
  0xb8   : > { %4750 = vmatprep.subr.bf16.mxu1 %v5056_v51  ;;  %4806 = vmatprep.subr.bf16.mxu0 %v5057_v56  ;;  %v5956_v63 = vld [vmem:[%s5155_s25 + $0x140] sm:$0xff] }
  0xbb   : > { %4751 = vmatpush3.bf16.msra.mxu1 %v5056_v51  ;;  %4807 = vmatpush3.bf16.msra.mxu0 %v5057_v56  ;;  %v6964_v51 = vpack.c.bf16 %v6962_v22, %v6963_v35  ;;  %v6965_v56 = vpack.c.bf16 %v5520_v61, %v5517_v6  ;;  %v6976_v6 = vpack.c.bf16 %v6974_v27, %v6975_v58 }
  0xbc   : > { %4752 = vmatprep.subr.bf16.mxu1 %v5058_v2  ;;  %4808 = vmatprep.subr.bf16.mxu0 %v5059_v32  ;;  %v6977_v61 = vpack.c.bf16 %v5594_v53, %v5583_v36  ;;  %v1299_v53 = vpack.c.bf16 %v5956_v63, %v5797_v7  ;;  %v6981_v36 = vld [vmem:[#allocation29_spill] sm:$0xff]  ;;  %v6986_v35 = vpack.c.bf16 %v5588_v14, %v5542_v38  ;;  %v6988_v38 = vld [vmem:[#allocation31_spill] sm:$0xff]  ;;  %v6989_v14 = vld [vmem:[#allocation34_spill] sm:$0xff] }
  0xbd   : > { %4657 = vmatmul.mubr.bf16.gmra.mxu1 %v6941_v44  ;;  %4713 = vmatmul.mubr.bf16.gmra.mxu0 %v6944_v12  ;;  %v3923_v12 = vld [vmem:[%s5155_s25 + $0x15a] sm:$0xff] }
  0xbe   : > { %4660 = vmatprep.mubr.bf16.mxu1 %v6945_v13  ;;  %4716 = vmatprep.mubr.bf16.mxu0 %v6948_v17  ;;  %v3924_v13 = vld [vmem:[%s5155_s25 + $0x162] sm:$0xff] }
  0xbf   : > { %4753 = vmatpush3.bf16.msra.mxu1 %v5058_v2  ;;  %4809 = vmatpush3.bf16.msra.mxu0 %v5059_v32  ;;  %v3920_v2 = vld [vmem:[%s5155_s25 + $0x142] sm:$0xff]  ;;  %v3921_v32 = vld [vmem:[%s5155_s25 + $0x14a] sm:$0xff]  ;;  %v1661_v7 = vpack.c.bf16 %v3924_v13, %v3923_v12  ;;  %v6997_v13 = vld [vmem:[#allocation49_spill] sm:$0xff] }
  0xc0   : > { %4754 = vmatprep.subr.bf16.mxu1 %v5060_v46  ;;  %4810 = vmatprep.subr.bf16.mxu0 %v5061_v57  ;;  %v6996_v12 = vld [vmem:[#allocation44_spill] sm:$0xff] }
  0xc3   : > { %4755 = vmatpush3.bf16.msra.mxu1 %v5060_v46  ;;  %4811 = vmatpush3.bf16.msra.mxu0 %v5061_v57  ;;  %v3922_v46 = vld [vmem:[%s5155_s25 + $0x152] sm:$0xff]  ;;  %v1659_v57 = vpack.c.bf16 %v3920_v2, %v6981_v36 }
  0xc4   : > { %4852 = vmatprep.subr.bf16.mxu1 %v5062_v19  ;;  %4908 = vmatprep.subr.bf16.mxu0 %v5063_v25  ;;  %v1660_v44 = vpack.c.bf16 %v3922_v46, %v3921_v32  ;;  %v6995_v2 = vld [vmem:[#allocation40_spill] sm:$0xff] }
  0xc5   : > { %4661 = vmatmul.mubr.bf16.gmra.mxu1 %v6949_v54  ;;  %4717 = vmatmul.mubr.bf16.gmra.mxu0 %v6952_v34  ;;  %v6982_v54 = vpack.c.bf16 %v5525_v62, %v5502_v20  ;;  %v5065_v62 = vld [vmem:[%s6800_s1 + $0x230] sm:$0xff]  }
  0xc6   : > { %4664 = vmatprep.mubr.bf16.mxu1 %v6953_v11  ;;  %4720 = vmatprep.mubr.bf16.mxu0 %v6956_v31  ;;  %v5072_v36 = vld [vmem:[%s6800_s1 + $0x1d0] sm:$0xff]  }
  0xcd   : > { %4665 = vmatmul.mubr.bf16.gmra.mxu1 %v6957_v45  ;;  %4721 = vmatmul.mubr.bf16.gmra.mxu0 %v6960_v50  ;;  %v5064_v45 = vld [vmem:[%s6800_s1 + $0x1f0] sm:$0xff]   ;;  %v6985_v50 = vld [vmem:[#allocation33_spill] sm:$0xff] }
  0xce   : > { %4668 = vmatprep.mubr.bf16.mxu1 %v6961_v8  ;;  %4724 = vmatprep.mubr.bf16.mxu0 %v6964_v51  ;;  %v6987_v51 = vld [vmem:[#allocation38_spill] sm:$0xff] }
  0xd5   : > { %4669 = vmatmul.mubr.bf16.gmra.mxu1 %v6965_v56  ;;  %4725 = vmatmul.mubr.bf16.gmra.mxu0 %v6968_v59  ;;  %v5066_v56 = vld [vmem:[%s6800_s1 + $0x1e8] sm:$0xff]   ;;  %v5068_v59 = vld [vmem:[%s6800_s1 + $0x1e0] sm:$0xff]  }
  0xd6   : > { %4672 = vmatprep.mubr.bf16.mxu1 %v6969_v21  ;;  %4728 = vmatprep.mubr.bf16.mxu0 %v6972_v23  ;;  %v5069_v21 = vld [vmem:[%s6800_s1 + $0x220] sm:$0xff]   ;;  %v6990_v23 = vpack.c.bf16 %v5597_v43, %v5591_v52  ;;  %v5071_v43 = vld [vmem:[%s6800_s1 + $0x218] sm:$0xff]  }
  0xdd   : > { %4673 = vmatmul.mubr.bf16.gmra.mxu1 %v6973_v18  ;;  %4729 = vmatmul.mubr.bf16.gmra.mxu0 %v6976_v6  ;;  %v6991_v18 = vld [vmem:[#allocation39_spill] sm:$0xff]  ;;  %v5070_v6 = vld [vmem:[%s6800_s1 + $0x1d8] sm:$0xff]  }
  0xde   : > { %4676 = vmatprep.mubr.bf16.mxu1 %v6977_v61  ;;  %4732 = vmatprep.mubr.bf16.mxu0 %v6980_v33  ;;  %v6994_v33 = vld [vmem:[#allocation37_spill] sm:$0xff] }
  0xdf   : > { %v2008_v32 = vpack.c.bf16 %v6995_v2, %v6994_v33  ;;  %v7004_v33 = vld [vmem:[#allocation46_spill] sm:$0xff]  ;;  %v7005_v2 = vld [vmem:[#allocation47_spill] sm:$0xff] }
  0xe5   : > { %4677 = vmatmul.mubr.bf16.gmra.mxu1 %v1299_v53  ;;  %4733 = vmatmul.mubr.bf16.gmra.mxu0 %v1659_v57  ;;  %v5073_v57 = vld [vmem:[%s6800_s1 + $0x210] sm:$0xff]  }
  0xe6   : > { %4680 = vmatprep.mubr.bf16.mxu1 %v1300_v55  ;;  %4736 = vmatprep.mubr.bf16.mxu0 %v1660_v44 }
  0xed   : > { %v5982_v16 = vpop.f32.mrf.mxu0  ;;  %v5984_v17 = vpop.f32.mrf.mxu1  ;;  %4681 = vmatmul.mubr.bf16.gmra.mxu1 %v1301_v1  ;;  %4737 = vmatmul.mubr.bf16.gmra.mxu0 %v1661_v7 }
  0xee   : > { %4756 = vmatprep.mubr.bf16.mxu1 %v6982_v54  ;;  %4812 = vmatprep.mubr.bf16.mxu0 %v6983_v24  ;;  %v5074_v54 = vld [vmem:[%s6800_s1 + $0x1c8] sm:$0xff]  }
  0xef   : > { %v5990_v26 = vpop.f32.mrf.mxu0  ;;  %v5992_v34 = vpop.f32.mrf.mxu1  ;;  %v5075_v24 = vld [vmem:[%s6800_s1 + $0x208] sm:$0xff]  }
  0xf1   : > { %v5994_v11 = vpop.f32.mrf.mxu0  ;;  %v5996_v15 = vpop.f32.mrf.mxu1 }
  0xf3   : > { %v5998_v28 = vpop.f32.mrf.mxu0  ;;  %v6000_v31 = vpop.f32.mrf.mxu1 }
  0xf5   : > { %v6008_v20 = vpop.f32.mrf.mxu0  ;;  %v6010_v30 = vpop.f32.mrf.mxu1  ;;  %4757 = vmatmul.mubr.bf16.vlgmr.msra.gmra.mxu1 %v6984_v41  ;;  %4813 = vmatmul.mubr.bf16.vlgmr.msra.gmra.mxu0 %v6985_v50  ;;  %v6998_v41 = vld [vmem:[#allocation41_spill] sm:$0xff]  ;;  %v6999_v50 = vld [vmem:[#allocation42_spill] sm:$0xff] }
  0xf6   : > { %4853 = vmatpush3.bf16.msra.mxu1 %v5062_v19  ;;  %4909 = vmatpush3.bf16.msra.mxu0 %v5063_v25  ;;  %v2006_v25 = vpack.c.bf16 %v6989_v14, %v6988_v38 }
  0xf7   : > { %v6016_v8 = vpop.f32.mrf.mxu0  ;;  %v6018_v22 = vpop.f32.mrf.mxu1  ;;  %4760 = vmatprep.mubr.bf16.mxu1 %v6986_v35  ;;  %4816 = vmatprep.mubr.bf16.mxu0 %v6987_v51  ;;  %v2009_v35 = vpack.c.bf16 %v6999_v50, %v6998_v41  ;;  %v7000_v51 = vld [vmem:[#allocation43_spill] sm:$0xff] }
  0xf8   : > { %4854 = vmatprep.subr.bf16.mxu1 %v5064_v45  ;;  %4910 = vmatprep.subr.bf16.mxu0 %v5065_v62  ;;  %v7008_v50 = vld [vmem:[#allocation55_spill] sm:$0xff] }
  0xf9   : > { %v6030_v3 = vpop.f32.mrf.mxu0  ;;  %v6032_v19 = vpop.f32.mrf.mxu1 }
  0xfa   : > { %4855 = vmatpush3.bf16.msra.mxu1 %v5064_v45  ;;  %4911 = vmatpush3.bf16.msra.mxu0 %v5065_v62 }
  0xfb   : > { %v6036_v42 = vpop.f32.mrf.mxu0  ;;  %v6038_v48 = vpop.f32.mrf.mxu1  ;;  %4856 = vmatprep.subr.bf16.mxu1 %v5066_v56  ;;  %4912 = vmatprep.subr.bf16.mxu0 %v5067_v5 }
  0xfd   : > { %v6046_v47 = vpop.f32.mrf.mxu0  ;;  %v6048_v9 = vpop.f32.mrf.mxu1  ;;  %4761 = vmatmul.mubr.bf16.gmra.mxu1 %v6990_v23  ;;  %4817 = vmatmul.mubr.bf16.gmra.mxu0 %v6991_v18  ;;  %v7002_v18 = vld [vmem:[#allocation50_spill] sm:$0xff] }
  0xfe   : > { %4764 = vmatprep.mubr.bf16.mxu1 %v2006_v25  ;;  %4820 = vmatprep.mubr.bf16.mxu0 %v5694_v49  ;;  %v6992_v49 = vld [vmem:[#allocation35_spill] sm:$0xff]  ;;  %v5076_v25 = vld [vmem:[%s6800_s1 + $0x1c0] sm:$0xff]  }
  0xff   : > { %v6055_v27 = vpop.f32.mrf.mxu0  ;;  %v6057_v58 = vpop.f32.mrf.mxu1  ;;  %4857 = vmatpush3.bf16.msra.mxu1 %v5066_v56  ;;  %4913 = vmatpush3.bf16.msra.mxu0 %v5067_v5  ;;  %v2007_v29 = vpack.c.bf16 %v6993_v39, %v6992_v49  ;;  %v7001_v56 = vld [vmem:[#allocation45_spill] sm:$0xff] }
 0x100   : > { %4858 = vmatprep.subr.bf16.mxu1 %v5068_v59  ;;  %4914 = vmatprep.subr.bf16.mxu0 %v5069_v21  ;;  %v2010_v5 = vpack.c.bf16 %v7001_v56, %v7000_v51  ;;  %v7009_v51 = vld [vmem:[#allocation57_spill] sm:$0xff] }
 0x101   : > { %v6065_v52 = vpop.f32.mrf.mxu0  ;;  %v6067_v61 = vpop.f32.mrf.mxu1 }
 0x103   : > { %v6073_v46 = vpop.f32.mrf.mxu0  ;;  %v6075_v53 = vpop.f32.mrf.mxu1  ;;  %4859 = vmatpush3.bf16.msra.mxu1 %v5068_v59  ;;  %4915 = vmatpush3.bf16.msra.mxu0 %v5069_v21  ;;  %v5077_v59 = vld [vmem:[%s6800_s1 + $0x200] sm:$0xff]  }
 0x104   : > { %4860 = vmatprep.subr.bf16.mxu1 %v5070_v6  ;;  %4916 = vmatprep.subr.bf16.mxu0 %v5071_v43 }
 0x105   : > { %v6083_v55 = vpop.f32.mrf.mxu0  ;;  %v6085_v44 = vpop.f32.mrf.mxu1  ;;  %4765 = vmatmul.mubr.bf16.gmra.mxu1 %v2007_v29  ;;  %4821 = vmatmul.mubr.bf16.gmra.mxu0 %v6996_v12 }
 0x106   : > { %4768 = vmatprep.mubr.bf16.mxu1 %v2008_v32  ;;  %4824 = vmatprep.mubr.bf16.mxu0 %v6997_v13  ;;  %v2011_v32 = vpack.c.bf16 %v7005_v2, %v7004_v33 }
 0x107   : > { %v6089_v1 = vpop.f32.mrf.mxu0  ;;  %v6091_v7 = vpop.f32.mrf.mxu1  ;;  %4861 = vmatpush3.bf16.msra.mxu1 %v5070_v6  ;;  %4917 = vmatpush3.bf16.msra.mxu0 %v5071_v43  ;;  %v7003_v6 = vld [vmem:[#allocation54_spill] sm:$0xff] }
 0x108   : > { %4862 = vmatprep.subr.bf16.mxu1 %v5072_v36  ;;  %4918 = vmatprep.subr.bf16.mxu0 %v5073_v57 }
 0x109   : > { %v6099_v45 = vpop.f32.mrf.mxu0  ;;  %v6101_v62 = vpop.f32.mrf.mxu1 }
 0x10b   : > { %v6107_v38 = vpop.f32.mrf.mxu0  ;;  %v6109_v14 = vpop.f32.mrf.mxu1  ;;  %4863 = vmatpush3.bf16.msra.mxu1 %v5072_v36  ;;  %4919 = vmatpush3.bf16.msra.mxu0 %v5073_v57  ;;  %v7006_v36 = vld [vmem:[#allocation48_spill] sm:$0xff]  ;;  %v7007_v57 = vld [vmem:[#allocation51_spill] sm:$0xff] }
 0x10c   : > { %4864 = vmatprep.subr.bf16.mxu1 %v5074_v54  ;;  %4920 = vmatprep.subr.bf16.mxu0 %v5075_v24  ;;  %v2012_v12 = vpack.c.bf16 %v7007_v57, %v7006_v36  ;;  %v7011_v36 = vld [vmem:[#allocation53_spill] sm:$0xff] }
 0x10d   : > { %v6117_v21 = vpop.f32.mrf.mxu0  ;;  %v6119_v23 = vpop.f32.mrf.mxu1  ;;  %4769 = vmatmul.mubr.bf16.gmra.mxu1 %v2009_v35  ;;  %4825 = vmatmul.mubr.bf16.gmra.mxu0 %v7002_v18  ;;  %v6143_v18 = vld [vmem:[%s5155_s25 + $0xec] sm:$0xff] }
 0x10e   : > { %4772 = vmatprep.mubr.bf16.mxu1 %v2010_v5  ;;  %4828 = vmatprep.mubr.bf16.mxu0 %v7003_v6  ;;  %v6146_v6 = vld [vmem:[%s5155_s25 + $0xf4] sm:$0xff] }
 0x10f   : > { %v6123_v43 = vpop.f32.mrf.mxu0  ;;  %v6125_v49 = vpop.f32.mrf.mxu1  ;;  %4865 = vmatpush3.bf16.msra.mxu1 %v5074_v54  ;;  %4921 = vmatpush3.bf16.msra.mxu0 %v5075_v24 }
 0x110   : > { %4866 = vmatprep.subr.bf16.mxu1 %v5076_v25  ;;  %4922 = vmatprep.subr.bf16.mxu0 %v5077_v59 }
 0x111   : > { %v6127_v39 = vpop.f32.mrf.mxu0  ;;  %v6129_v29 = vpop.f32.mrf.mxu1 }
 0x113   : > { %v6135_v13 = vpop.f32.mrf.mxu0  ;;  %v6137_v41 = vpop.f32.mrf.mxu1  ;;  %4867 = vmatpush3.bf16.msra.mxu1 %v5076_v25  ;;  %4923 = vmatpush3.bf16.msra.mxu0 %v5077_v59 }
 0x115   : > { %v4534_v54 = vpop.f32.mrf.mxu1  ;;  %v4590_v24 = vpop.f32.mrf.mxu0  ;;  %4773 = vmatmul.mubr.bf16.gmra.mxu1 %v2011_v32  ;;  %4829 = vmatmul.mubr.bf16.gmra.mxu0 %v7008_v50  ;;  %v7010_v32 = vld [vmem:[#allocation52_spill] sm:$0xff] }
 0x116   : > { %v730_v35 = vadd.f32 %v4534_v54, %v5982_v16  ;;  %4776 = vmatprep.mubr.bf16.mxu1 %v2012_v12  ;;  %4832 = vmatprep.mubr.bf16.mxu0 %v7009_v51  ;;  %v2013_v57 = vpack.c.bf16 %v7011_v36, %v7010_v32  ;;  %v2014_v54 = vpack.c.bf16 %v6146_v6, %v6143_v18  ;;  %v6170_v32 = vld [vmem:[%s5155_s25 + $0x10c] sm:$0xff] }
 0x117   : > { %v721_v56 = vpop.f32.mrf.mxu1  ;;  %v1041_v5 = vpop.f32.mrf.mxu0 }
 0x118   : > { %v6148_v33 = vadd.f32 %v4590_v24, %v730_v35  ;;  %v722_v25 = vadd.f32 %v721_v56, %v5990_v26 }
 0x119   : > { %v4535_v59 = vpop.f32.mrf.mxu1  ;;  %v4591_v2 = vpop.f32.mrf.mxu0 }
 0x11a   : > { %v6153_v16 = vadd.f32 %v1041_v5, %v722_v25  ;;  %v733_v12 = vadd.f32 %v4535_v59, %v5994_v11  ;;  %v7014_v5 = vld [vmem:[#allocation58_spill] sm:$0xff] }
 0x11b   : > { %v724_v50 = vpop.f32.mrf.mxu1  ;;  %v1044_v24 = vpop.f32.mrf.mxu0  ;;  %v6167_v59 = vld [vmem:[%s5155_s25 + $0xfc] sm:$0xff] }
 0x11c   : > { %7012 = vst [vmem:[#allocation8_spill] sm:$0xff] %v6153_v16  ;;  %v6158_v35 = vadd.f32 %v4591_v2, %v733_v12  ;;  %v725_v26 = vadd.f32 %v724_v50, %v5998_v28  ;;  %v6173_v12 = vld [vmem:[%s5155_s25 + $0x114] sm:$0xff] }
 0x11d   : > { %v4538_v51 = vpop.f32.mrf.mxu1  ;;  %v4594_v56 = vpop.f32.mrf.mxu0  ;;  %4777 = vmatmul.mubr.bf16.gmra.mxu1 %v2013_v57  ;;  %4833 = vmatmul.mubr.bf16.gmra.mxu0 %v7014_v5  ;;  %v4041_v28 = vld [vmem:[%s5155_s25 + $0x130] sm:$0xff]  ;;  %v4042_v50 = vld [vmem:[%s5155_s25 + $0x138] sm:$0xff] }
 0x11e   : > { %7013 = vst [vmem:[#allocation12_spill] sm:$0xff] %v6158_v35  ;;  %v6162_v25 = vadd.f32 %v1044_v24, %v725_v26  ;;  %v746_v11 = vadd.f32 %v4538_v51, %v6008_v20  ;;  %4780 = vmatprep.mubr.bf16.mxu1 %v2014_v54  ;;  %4836 = vmatprep.mubr.bf16.mxu0 %v5788_v37  ;;  %v7016_v20 = vld [vmem:[#allocation56_spill] sm:$0xff] }
 0x11f   : > { %v737_v2 = vpop.f32.mrf.mxu1  ;;  %v1057_v36 = vpop.f32.mrf.mxu0  ;;  %v2015_v54 = vpack.c.bf16 %v7016_v20, %v6167_v59  ;;  %v2376_v35 = vpack.c.bf16 %v4042_v50, %v4041_v28  ;;  %v6195_v28 = vld [vmem:[%s5155_s25 + $0x11c] sm:$0xff]  ;;  %v6198_v50 = vld [vmem:[%s5155_s25 + $0x124] sm:$0xff] }
 0x120   : > { %7015 = vst [vmem:[#allocation11_spill] sm:$0xff] %v6162_v25  ;;  %v6177_v57 = vadd.f32 %v4594_v56, %v746_v11  ;;  %v738_v24 = vadd.f32 %v737_v2, %v6016_v8  ;;  %v2016_v25 = vpack.c.bf16 %v6173_v12, %v6170_v32 }
 0x121   : > { %v4539_v26 = vpop.f32.mrf.mxu1  ;;  %v4595_v5 = vpop.f32.mrf.mxu0 }
 0x122   : > { %v6182_v37 = vadd.f32 %v1057_v36, %v738_v24  ;;  %v749_v51 = vadd.f32 %v4539_v26, %v6030_v3 }
 0x123   : > { %v740_v16 = vpop.f32.mrf.mxu1  ;;  %v1060_v56 = vpop.f32.mrf.mxu0 }
 0x124   : > { %v6187_v8 = vadd.f32 %v4595_v5, %v749_v51  ;;  %v741_v11 = vadd.f32 %v740_v16, %v6036_v42  ;;  %v6201_v5 = vld [vmem:[%s5155_s25 + $0x12c] sm:$0xff]  ;;  %v6204_v42 = vld [vmem:[%s5155_s25 + $0x134] sm:$0xff] }
 0x125   : > { %v4542_v2 = vpop.f32.mrf.mxu1  ;;  %v4598_v20 = vpop.f32.mrf.mxu0  ;;  %4781 = vmatmul.mubr.bf16.gmra.mxu1 %v2015_v54  ;;  %4837 = vmatmul.mubr.bf16.gmra.mxu0 %v5792_v60 }
 0x126   : > { %v6191_v36 = vadd.f32 %v1060_v56, %v741_v11  ;;  %v762_v3 = vadd.f32 %v4542_v2, %v6046_v47  ;;  %4784 = vmatprep.mubr.bf16.mxu1 %v2016_v25  ;;  %4840 = vmatprep.mubr.bf16.mxu0 %v2376_v35  ;;  %v2017_v47 = vpack.c.bf16 %v6198_v50, %v6195_v28 }
 0x127   : > { %v753_v24 = vpop.f32.mrf.mxu1  ;;  %v1073_v26 = vpop.f32.mrf.mxu0  ;;  %v2377_v35 = vpack.c.bf16 %v5960_v4, %v5956_v63  ;;  %v2018_v11 = vpack.c.bf16 %v6204_v42, %v6201_v5 }
 0x128   : > { %v6206_v16 = vadd.f32 %v4598_v20, %v762_v3  ;;  %v754_v60 = vadd.f32 %v753_v24, %v6055_v27  ;;  %v2378_v27 = vpack.c.bf16 %v5973_v40, %v5963_v10  ;;  %v6224_v24 = vld [vmem:[%s5155_s25 + $0x13c] sm:$0xff]  ;;  %v6230_v40 = vld [vmem:[%s5155_s25 + $0x144] sm:$0xff] }
 0x129   : > { %v4543_v54 = vpop.f32.mrf.mxu1  ;;  %v4599_v51 = vpop.f32.mrf.mxu0  ;;  %7019 = vst [vmem:[#allocation20_spill] sm:$0xff] %v6230_v40 }
 0x12a   : > { %v6213_v25 = vadd.f32 %v1073_v26, %v754_v60  ;;  %v765_v56 = vadd.f32 %v4543_v54, %v6065_v52  ;;  %v4048_v60 = vld [vmem:[%s5155_s25 + $0x168] sm:$0xff] }
 0x12b   : > { %v756_v2 = vpop.f32.mrf.mxu1  ;;  %v1076_v20 = vpop.f32.mrf.mxu0  ;;  %v6234_v54 = vld [vmem:[%s5155_s25 + $0x14c] sm:$0xff] }
 0x12c   : > { %v6220_v3 = vadd.f32 %v4599_v51, %v765_v56  ;;  %v757_v63 = vadd.f32 %v756_v2, %v6073_v46  ;;  %v6237_v56 = vld [vmem:[%s5155_s25 + $0x154] sm:$0xff] }
 0x12d   : > { %v4546_v4 = vpop.f32.mrf.mxu1  ;;  %v4602_v52 = vpop.f32.mrf.mxu0  ;;  %4785 = vmatmul.mubr.bf16.gmra.mxu1 %v2017_v47  ;;  %4841 = vmatmul.mubr.bf16.gmra.mxu0 %v2377_v35  ;;  %v4049_v2 = vld [vmem:[%s5155_s25 + $0x170] sm:$0xff]  ;;  %v4050_v47 = vld [vmem:[%s5155_s25 + $0x178] sm:$0xff] }
 0x12e   : > { %7017 = vst [vmem:[#allocation16_spill] sm:$0xff] %v6220_v3  ;;  %v6226_v26 = vadd.f32 %v1076_v20, %v757_v63  ;;  %v778_v10 = vadd.f32 %v4546_v4, %v6083_v55  ;;  %4788 = vmatprep.mubr.bf16.mxu1 %v2018_v11  ;;  %4844 = vmatprep.mubr.bf16.mxu0 %v2378_v27 }
 0x12f   : > { %v769_v46 = vpop.f32.mrf.mxu1  ;;  %v1089_v51 = vpop.f32.mrf.mxu0  ;;  %v2019_v11 = vpack.c.bf16 %v6230_v40, %v6224_v24  ;;  %v2379_v27 = vpack.c.bf16 %v4048_v60, %v5976_v0  ;;  %v2020_v3 = vpack.c.bf16 %v6237_v56, %v6234_v54  ;;  %v6259_v60 = vld [vmem:[%s5155_s25 + $0x164] sm:$0xff] }
 0x130   : > { %7018 = vst [vmem:[#allocation15_spill] sm:$0xff] %v6226_v26  ;;  %v6241_v35 = vadd.f32 %v4602_v52, %v778_v10  ;;  %v770_v20 = vadd.f32 %v769_v46, %v6089_v1  ;;  %v2380_v52 = vpack.c.bf16 %v4050_v47, %v4049_v2  ;;  %7023 = vst [vmem:[#allocation23_spill] sm:$0xff] %v6259_v60  ;;  %v4052_v47 = vld [vmem:[%s5155_s25 + $0x188] sm:$0xff] }
 0x131   : > { %v4547_v63 = vpop.f32.mrf.mxu1  ;;  %v4603_v55 = vpop.f32.mrf.mxu0 }
 0x132   : > { %7020 = vst [vmem:[#allocation19_spill] sm:$0xff] %v6241_v35  ;;  %v6247_v4 = vadd.f32 %v1089_v51, %v770_v20  ;;  %v781_v26 = vadd.f32 %v4547_v63, %v6099_v45  ;;  %v6256_v45 = vld [vmem:[%s5155_s25 + $0x15c] sm:$0xff] }
 0x133   : > { %v772_v1 = vpop.f32.mrf.mxu1  ;;  %v1092_v10 = vpop.f32.mrf.mxu0 }
 0x134   : > { %7021 = vst [vmem:[#allocation30_spill] sm:$0xff] %v6247_v4  ;;  %v6252_v46 = vadd.f32 %v4603_v55, %v781_v26  ;;  %v773_v35 = vadd.f32 %v772_v1, %v6107_v38  ;;  %v4051_v26 = vld [vmem:[%s5155_s25 + $0x180] sm:$0xff]  ;;  %v4077_v38 = vld [vmem:[%s5155_s25 + $0x52] sm:$0xff] }
 0x135   : > { %v4550_v40 = vpop.f32.mrf.mxu1  ;;  %v4606_v0 = vpop.f32.mrf.mxu0  ;;  %4789 = vmatmul.mubr.bf16.gmra.mxu1 %v2019_v11  ;;  %4845 = vmatmul.mubr.bf16.gmra.mxu0 %v2379_v27  ;;  %v4078_v55 = vld [vmem:[%s5155_s25 + $0x5a] sm:$0xff] }
 0x136   : > { %7022 = vst [vmem:[#allocation2_spill] sm:$0xff] %v6252_v46  ;;  %v6261_v51 = vadd.f32 %v1092_v10, %v773_v35  ;;  %v794_v2 = vadd.f32 %v4550_v40, %v6117_v21  ;;  %4792 = vmatprep.mubr.bf16.mxu1 %v2020_v3  ;;  %4848 = vmatprep.mubr.bf16.mxu0 %v2380_v52  ;;  %v4141_v1 = vld [vmem:[%s5155_s25 + $0x54] sm:$0xff]  ;;  %v4142_v46 = vld [vmem:[%s5155_s25 + $0x5c] sm:$0xff] }
 0x137   : > { %v785_v20 = vpop.f32.mrf.mxu1  ;;  %v1105_v63 = vpop.f32.mrf.mxu0  ;;  %v2021_v21 = vpack.c.bf16 %v6259_v60, %v6256_v45  ;;  %v2381_v3 = vpack.c.bf16 %v4052_v47, %v4051_v26  ;;  %v2722_v10 = vpack.c.bf16 %v4078_v55, %v4077_v38  ;;  %v4079_v26 = vld [vmem:[%s5155_s25 + $0x62] sm:$0xff]  ;;  %v4144_v38 = vld [vmem:[%s5155_s25 + $0x6c] sm:$0xff] }
 0x138   : > { %7024 = vst [vmem:[#allocation4_spill] sm:$0xff] %v6261_v51  ;;  %v6270_v11 = vadd.f32 %v4606_v0, %v794_v2  ;;  %v786_v27 = vadd.f32 %v785_v20, %v6123_v43  ;;  %v3082_v51 = vpack.c.bf16 %v4142_v46, %v4141_v1  ;;  %v4143_v47 = vld [vmem:[%s5155_s25 + $0x64] sm:$0xff]  ;;  %v4082_v1 = vld [vmem:[%s5155_s25 + $0x7a] sm:$0xff] }
 0x139   : > { %v4551_v4 = vpop.f32.mrf.mxu1  ;;  %v4607_v35 = vpop.f32.mrf.mxu0 }
 0x13a   : > { %7025 = vst [vmem:[#allocation3_spill] sm:$0xff] %v6270_v11  ;;  %v6275_v40 = vadd.f32 %v1105_v63, %v786_v27  ;;  %v797_v52 = vadd.f32 %v4551_v4, %v6127_v39  ;;  %v4080_v39 = vld [vmem:[%s5155_s25 + $0x6a] sm:$0xff]  ;;  %v4081_v63 = vld [vmem:[%s5155_s25 + $0x72] sm:$0xff] }
 0x13b   : > { %v788_v0 = vpop.f32.mrf.mxu1  ;;  %v1108_v2 = vpop.f32.mrf.mxu0  ;;  %v4145_v27 = vld [vmem:[%s5155_s25 + $0x74] sm:$0xff] }
 0x13c   : > { %v6278_v43 = vadd.f32 %v4607_v35, %v797_v52  ;;  %v789_v20 = vadd.f32 %v788_v0, %v6135_v13  ;;  %v4146_v35 = vld [vmem:[%s5155_s25 + $0x7c] sm:$0xff] }
 0x13d   : > { %v4554_v11 = vpop.f32.mrf.mxu1  ;;  %v4610_v60 = vpop.f32.mrf.mxu0  ;;  %4793 = vmatmul.mubr.bf16.gmra.mxu1 %v2021_v21  ;;  %4849 = vmatmul.mubr.bf16.gmra.mxu0 %v2381_v3 }
 0x13e   : > { %v6283_v4 = vadd.f32 %v1108_v2, %v789_v20  ;;  %v810_v46 = vadd.f32 %v4554_v11, %v5984_v17  ;;  %4868 = vmatprep.mubr.bf16.mxu1 %v2722_v10  ;;  %4924 = vmatprep.mubr.bf16.mxu0 %v3082_v51  ;;  %v2723_v2 = vpack.c.bf16 %v4080_v39, %v4079_v26  ;;  %v4083_v39 = vld [vmem:[%s5155_s25 + $0x82] sm:$0xff] }
 0x13f   : > { %v801_v55 = vpop.f32.mrf.mxu1  ;;  %v1121_v13 = vpop.f32.mrf.mxu0  ;;  %v3083_v17 = vpack.c.bf16 %v4144_v38, %v4143_v47  ;;  %v2724_v10 = vpack.c.bf16 %v4082_v1, %v4081_v63  ;;  %v3084_v20 = vpack.c.bf16 %v4146_v35, %v4145_v27  ;;  %v4147_v63 = vld [vmem:[%s5155_s25 + $0x84] sm:$0xff]  ;;  %v4085_v1 = vld [vmem:[%s5155_s25 + $0x92] sm:$0xff] }
 0x140   : > { %7026 = vst [vmem:[#allocation6_spill] sm:$0xff] %v6283_v4  ;;  %v6292_v52 = vadd.f32 %v4610_v60, %v810_v46  ;;  %v802_v21 = vadd.f32 %v801_v55, %v5992_v34  ;;  %v4149_v35 = vld [vmem:[%s5155_s25 + $0x94] sm:$0xff] }
 0x141   : > { %v4555_v3 = vpop.f32.mrf.mxu1  ;;  %v4611_v0 = vpop.f32.mrf.mxu0 }
 0x142   : > { %v6295_v11 = vadd.f32 %v1121_v13, %v802_v21  ;;  %v813_v51 = vadd.f32 %v4555_v3, %v5996_v15  ;;  %v4084_v15 = vld [vmem:[%s5155_s25 + $0x8a] sm:$0xff]  ;;  %v4150_v21 = vld [vmem:[%s5155_s25 + $0x9c] sm:$0xff] }
 0x143   : > { %v804_v4 = vpop.f32.mrf.mxu1  ;;  %v1124_v60 = vpop.f32.mrf.mxu0  ;;  %v4148_v13 = vld [vmem:[%s5155_s25 + $0x8c] sm:$0xff] }
 0x144   : > { %v6298_v46 = vadd.f32 %v4611_v0, %v813_v51  ;;  %v805_v34 = vadd.f32 %v804_v4, %v6000_v31  ;;  %v4086_v4 = vld [vmem:[%s5155_s25 + $0x9a] sm:$0xff]  ;;  %v2725_v51 = vpack.c.bf16 %v4084_v15, %v4083_v39  ;;  %v4087_v15 = vld [vmem:[%s5155_s25 + $0xa2] sm:$0xff] }
 0x145   : > { %v4558_v55 = vpop.f32.mrf.mxu1  ;;  %v4614_v26 = vpop.f32.mrf.mxu0  ;;  %4869 = vmatmul.mubr.bf16.vlgmr.msra.gmra.mxu1 %v2723_v2  ;;  %4925 = vmatmul.mubr.bf16.vlgmr.msra.gmra.mxu0 %v3083_v17 }
 0x146   : > { %v6303_v47 = vadd.f32 %v1124_v60, %v805_v34  ;;  %v826_v38 = vadd.f32 %v4558_v55, %v6010_v30  ;;  %4872 = vmatprep.mubr.bf16.mxu1 %v2724_v10  ;;  %4928 = vmatprep.mubr.bf16.mxu0 %v3084_v20  ;;  %v3085_v30 = vpack.c.bf16 %v4148_v13, %v4147_v63 }
 0x147   : > { %v817_v27 = vpop.f32.mrf.mxu1  ;;  %v1137_v31 = vpop.f32.mrf.mxu0  ;;  %v2726_v60 = vpack.c.bf16 %v4086_v4, %v4085_v1  ;;  %v3086_v34 = vpack.c.bf16 %v4150_v21, %v4149_v35  ;;  %v4151_v1 = vld [vmem:[%s5155_s25 + $0xa4] sm:$0xff]  ;;  %v4089_v4 = vld [vmem:[%s5155_s25 + $0xb2] sm:$0xff]  ;;  %v4090_v21 = vld [vmem:[%s5155_s25 + $0xba] sm:$0xff] }
 0x148   : > { %v6312_v3 = vadd.f32 %v4614_v26, %v826_v38  ;;  %v818_v0 = vadd.f32 %v817_v27, %v6018_v22 }
 0x149   : > { %v4559_v2 = vpop.f32.mrf.mxu1  ;;  %v4615_v17 = vpop.f32.mrf.mxu0 }
 0x14a   : > { %v6315_v10 = vadd.f32 %v1137_v31, %v818_v0  ;;  %v829_v20 = vadd.f32 %v4559_v2, %v6032_v19  ;;  %v4088_v19 = vld [vmem:[%s5155_s25 + $0xaa] sm:$0xff]  ;;  %v4153_v0 = vld [vmem:[%s5155_s25 + $0xb4] sm:$0xff]  ;;  %v4154_v2 = vld [vmem:[%s5155_s25 + $0xbc] sm:$0xff] }
 0x14b   : > { %v820_v55 = vpop.f32.mrf.mxu1  ;;  %v1140_v26 = vpop.f32.mrf.mxu0  ;;  %v4152_v31 = vld [vmem:[%s5155_s25 + $0xac] sm:$0xff] }
 0x14c   : > { %v6318_v38 = vadd.f32 %v4615_v17, %v829_v20  ;;  %v821_v22 = vadd.f32 %v820_v55, %v6038_v48  ;;  %v2727_v55 = vpack.c.bf16 %v4088_v19, %v4087_v15  ;;  %v4091_v19 = vld [vmem:[%s5155_s25 + $0xc2] sm:$0xff] }
 0x14d   : > { %v4562_v27 = vpop.f32.mrf.mxu1  ;;  %v4618_v39 = vpop.f32.mrf.mxu0  ;;  %4873 = vmatmul.mubr.bf16.gmra.mxu1 %v2725_v51  ;;  %4929 = vmatmul.mubr.bf16.gmra.mxu0 %v3085_v30 }
 0x14e   : > { %v6323_v63 = vadd.f32 %v1140_v26, %v821_v22  ;;  %v842_v13 = vadd.f32 %v4562_v27, %v6048_v9  ;;  %4876 = vmatprep.mubr.bf16.mxu1 %v2726_v60  ;;  %4932 = vmatprep.mubr.bf16.mxu0 %v3086_v34  ;;  %v3087_v9 = vpack.c.bf16 %v4152_v31, %v4151_v1 }
 0x14f   : > { %v833_v35 = vpop.f32.mrf.mxu1  ;;  %v1153_v48 = vpop.f32.mrf.mxu0  ;;  %v2728_v26 = vpack.c.bf16 %v4090_v21, %v4089_v4  ;;  %v3088_v22 = vpack.c.bf16 %v4154_v2, %v4153_v0  ;;  %v4155_v4 = vld [vmem:[%s5155_s25 + $0xc4] sm:$0xff]  ;;  %v4093_v21 = vld [vmem:[%s5155_s25 + $0xd2] sm:$0xff]  ;;  %v4094_v2 = vld [vmem:[%s5155_s25 + $0xda] sm:$0xff] }
 0x150   : > { %v6332_v17 = vadd.f32 %v4618_v39, %v842_v13  ;;  %v834_v51 = vadd.f32 %v833_v35, %v6057_v58 }
 0x151   : > { %v4563_v30 = vpop.f32.mrf.mxu1  ;;  %v4619_v20 = vpop.f32.mrf.mxu0 }
 0x152   : > { %v6335_v60 = vadd.f32 %v1153_v48, %v834_v51  ;;  %v845_v34 = vadd.f32 %v4563_v30, %v6067_v61  ;;  %v4092_v61 = vld [vmem:[%s5155_s25 + $0xca] sm:$0xff]  ;;  %v4157_v51 = vld [vmem:[%s5155_s25 + $0xd4] sm:$0xff]  ;;  %v4158_v30 = vld [vmem:[%s5155_s25 + $0xdc] sm:$0xff] }
 0x153   : > { %v836_v27 = vpop.f32.mrf.mxu1  ;;  %v1156_v39 = vpop.f32.mrf.mxu0  ;;  %v4156_v48 = vld [vmem:[%s5155_s25 + $0xcc] sm:$0xff] }
 0x154   : > { %v6338_v13 = vadd.f32 %v4619_v20, %v845_v34  ;;  %v837_v58 = vadd.f32 %v836_v27, %v6075_v53  ;;  %v2729_v27 = vpack.c.bf16 %v4092_v61, %v4091_v19 }
 0x155   : > { %v4566_v35 = vpop.f32.mrf.mxu1  ;;  %v4622_v15 = vpop.f32.mrf.mxu0  ;;  %4877 = vmatmul.mubr.bf16.gmra.mxu1 %v2727_v55  ;;  %4933 = vmatmul.mubr.bf16.gmra.mxu0 %v3087_v9 }
 0x156   : > { %v6343_v1 = vadd.f32 %v1156_v39, %v837_v58  ;;  %v858_v31 = vadd.f32 %v4566_v35, %v6085_v44  ;;  %4880 = vmatprep.mubr.bf16.mxu1 %v2728_v26  ;;  %4936 = vmatprep.mubr.bf16.mxu0 %v3088_v22  ;;  %v3089_v39 = vpack.c.bf16 %v4156_v48, %v4155_v4  ;;  %v4095_v4 = vld [vmem:[%s5155_s25 + $0xe2] sm:$0xff]  ;;  %v4096_v48 = vld [vmem:[%s5155_s25 + $0xea] sm:$0xff] }
 0x157   : > { %v849_v0 = vpop.f32.mrf.mxu1  ;;  %v1169_v53 = vpop.f32.mrf.mxu0  ;;  %v2730_v26 = vpack.c.bf16 %v4094_v2, %v4093_v21  ;;  %v3090_v22 = vpack.c.bf16 %v4158_v30, %v4157_v51  ;;  %v4159_v21 = vld [vmem:[%s5155_s25 + $0xe4] sm:$0xff]  ;;  %v4097_v2 = vld [vmem:[%s5155_s25 + $0xf2] sm:$0xff]  ;;  %v4098_v51 = vld [vmem:[%s5155_s25 + $0xfa] sm:$0xff] }
 0x158   : > { %7027 = vst [vmem:[#allocation5_spill] sm:$0xff] %v6343_v1  ;;  %v6352_v20 = vadd.f32 %v4622_v15, %v858_v31  ;;  %v850_v55 = vadd.f32 %v849_v0, %v6091_v7 }
 0x159   : > { %v4567_v9 = vpop.f32.mrf.mxu1  ;;  %v4623_v34 = vpop.f32.mrf.mxu0 }
 0x15a   : > { %v6355_v58 = vadd.f32 %v1169_v53, %v850_v55  ;;  %v861_v44 = vadd.f32 %v4567_v9, %v6101_v62 }
 0x15b   : > { %v852_v35 = vpop.f32.mrf.mxu1  ;;  %v1172_v1 = vpop.f32.mrf.mxu0 }
 0x15c   : > { %v6358_v15 = vadd.f32 %v4623_v34, %v861_v44  ;;  %v853_v7 = vadd.f32 %v852_v35, %v6109_v14  ;;  %v2731_v34 = vpack.c.bf16 %v4096_v48, %v4095_v4  ;;  %v3092_v44 = vpack.c.bf16 %v6167_v59, %v6146_v6  ;;  %v4100_v6 = vld [vmem:[%s5155_s25 + $0x10a] sm:$0xff]  ;;  %v4101_v48 = vld [vmem:[%s5155_s25 + $0x112] sm:$0xff] }
 0x15d   : > { %v4570_v31 = vpop.f32.mrf.mxu1  ;;  %v4626_v19 = vpop.f32.mrf.mxu0  ;;  %4881 = vmatmul.mubr.bf16.gmra.mxu1 %v2729_v27  ;;  %4937 = vmatmul.mubr.bf16.gmra.mxu0 %v3089_v39  ;;  %v2732_v39 = vpack.c.bf16 %v4098_v51, %v4097_v2  ;;  %v4163_v59 = vld [vmem:[%s5155_s25 + $0x104] sm:$0xff] }
 0x15e   : > { %v6361_v61 = vadd.f32 %v1172_v1, %v853_v7  ;;  %v874_v62 = vadd.f32 %v4570_v31, %v6119_v23  ;;  %4884 = vmatprep.mubr.bf16.mxu1 %v2730_v26  ;;  %4940 = vmatprep.mubr.bf16.mxu0 %v3090_v22  ;;  %v3091_v1 = vpack.c.bf16 %v6143_v18, %v4159_v21  ;;  %v4102_v21 = vld [vmem:[%s5155_s25 + $0x11a] sm:$0xff] }
 0x15f   : > { %v865_v0 = vpop.f32.mrf.mxu1  ;;  %v1185_v53 = vpop.f32.mrf.mxu0 }
 0x160   : > { %v6369_v30 = vadd.f32 %v4626_v19, %v874_v62  ;;  %v866_v14 = vadd.f32 %v865_v0, %v6125_v49  ;;  %v4099_v19 = vld [vmem:[%s5155_s25 + $0x102] sm:$0xff] }
 0x161   : > { %v4571_v55 = vpop.f32.mrf.mxu1  ;;  %v4627_v9 = vpop.f32.mrf.mxu0 }
 0x162   : > { %v6373_v27 = vadd.f32 %v1185_v53, %v866_v14  ;;  %v877_v23 = vadd.f32 %v4571_v55, %v6129_v29  ;;  %v2733_v14 = vpack.c.bf16 %v4100_v6, %v4099_v19  ;;  %v3093_v55 = vpack.c.bf16 %v6170_v32, %v4163_v59  ;;  %v4103_v19 = vld [vmem:[%s5155_s25 + $0x122] sm:$0xff]  ;;  %v4105_v59 = vld [vmem:[%s5155_s25 + $0x132] sm:$0xff] }
 0x163   : > { %v868_v26 = vpop.f32.mrf.mxu1  ;;  %v1188_v22 = vpop.f32.mrf.mxu0 }
 0x164   : > { %v6378_v49 = vadd.f32 %v4627_v9, %v877_v23  ;;  %v869_v35 = vadd.f32 %v868_v26, %v6137_v41  ;;  %v7028_v41 = vld [vmem:[#allocation8_spill] sm:$0xff]  ;;  %v3094_v23 = vpack.c.bf16 %v6195_v28, %v6173_v12 }
 0x165   : > { %v4646_v18 = vpop.f32.mrf.mxu1  ;;  %v4702_v7 = vpop.f32.mrf.mxu0  ;;  %4885 = vmatmul.mubr.bf16.gmra.mxu1 %v2731_v34  ;;  %4941 = vmatmul.mubr.bf16.gmra.mxu0 %v3091_v1  ;;  %v2734_v1 = vpack.c.bf16 %v4102_v21, %v4101_v48  ;;  %v4104_v12 = vld [vmem:[%s5155_s25 + $0x12a] sm:$0xff] }
 0x166   : > { %v6381_v31 = vadd.f32 %v1188_v22, %v869_v35  ;;  %v1562_v29 = vadd.f32 %v4646_v18, %v6148_v33  ;;  %4888 = vmatprep.mubr.bf16.mxu1 %v2732_v39  ;;  %4944 = vmatprep.mubr.bf16.mxu0 %v3092_v44  ;;  %v7029_v33 = vld [vmem:[#allocation12_spill] sm:$0xff]  ;;  %v7030_v22 = vld [vmem:[#allocation11_spill] sm:$0xff] }
 0x167   : > { %v1401_v62 = vpop.f32.mrf.mxu1  ;;  %v1761_v4 = vpop.f32.mrf.mxu0 }
 0x168   : > { %v6389_v0 = vadd.f32 %v4702_v7, %v1562_v29  ;;  %v1560_v53 = vadd.f32 %v1401_v62, %v7028_v41  ;;  %v4106_v62 = vld [vmem:[%s5155_s25 + $0x13a] sm:$0xff] }
 0x169   : > { %v4647_v2 = vpop.f32.mrf.mxu1  ;;  %v4703_v51 = vpop.f32.mrf.mxu0 }
 0x16a   : > { %v6393_v9 = vadd.f32 %v1761_v4, %v1560_v53  ;;  %v1563_v34 = vadd.f32 %v4647_v2, %v7029_v33  ;;  %v2735_v53 = vpack.c.bf16 %v4104_v12, %v4103_v19  ;;  %v3095_v2 = vpack.c.bf16 %v6201_v5, %v6198_v50  ;;  %v7031_v12 = vld [vmem:[#allocation20_spill] sm:$0xff] }
 0x16b   : > { %v1404_v39 = vpop.f32.mrf.mxu1  ;;  %v1764_v44 = vpop.f32.mrf.mxu0 }
 0x16c   : > { %v6398_v26 = vadd.f32 %v4703_v51, %v1563_v34  ;;  %v1561_v35 = vadd.f32 %v1404_v39, %v7030_v22  ;;  %v4107_v39 = vld [vmem:[%s5155_s25 + $0x142] sm:$0xff]  ;;  %v4109_v22 = vld [vmem:[%s5155_s25 + $0x152] sm:$0xff] }
 0x16d   : > { %v4650_v18 = vpop.f32.mrf.mxu1  ;;  %v4706_v32 = vpop.f32.mrf.mxu0  ;;  %4889 = vmatmul.mubr.bf16.gmra.mxu1 %v2733_v14  ;;  %4945 = vmatmul.mubr.bf16.gmra.mxu0 %v3093_v55  ;;  %v2736_v14 = vpack.c.bf16 %v4106_v62, %v4105_v59  ;;  %v3096_v55 = vpack.c.bf16 %v6224_v24, %v6204_v42  ;;  %v4108_v42 = vld [vmem:[%s5155_s25 + $0x14a] sm:$0xff] }
 0x16e   : > { %v6401_v7 = vadd.f32 %v1764_v44, %v1561_v35  ;;  %v1566_v29 = vadd.f32 %v4650_v18, %v6177_v57  ;;  %4892 = vmatprep.mubr.bf16.mxu1 %v2734_v1  ;;  %4948 = vmatprep.mubr.bf16.mxu0 %v3094_v23  ;;  %v4110_v35 = vld [vmem:[%s5155_s25 + $0x15a] sm:$0xff]  ;;  %v2737_v19 = vpack.c.bf16 %v4108_v42, %v4107_v39 }
 0x16f   : > { %v1417_v28 = vpop.f32.mrf.mxu1  ;;  %v1777_v6 = vpop.f32.mrf.mxu0  ;;  %v2738_v62 = vpack.c.bf16 %v4110_v35, %v4109_v22  ;;  %v4177_v39 = vld [vmem:[%s5155_s25 + $0x174] sm:$0xff]  ;;  %v4178_v42 = vld [vmem:[%s5155_s25 + $0x17c] sm:$0xff] }
 0x170   : > { %v6408_v4 = vadd.f32 %v4706_v32, %v1566_v29  ;;  %v1564_v48 = vadd.f32 %v1417_v28, %v6182_v37  ;;  %v3097_v28 = vpack.c.bf16 %v6234_v54, %v7031_v12 }
 0x171   : > { %v4651_v21 = vpop.f32.mrf.mxu1  ;;  %v4707_v41 = vpop.f32.mrf.mxu0 }
 0x172   : > { %v6413_v51 = vadd.f32 %v1777_v6, %v1564_v48  ;;  %v1567_v57 = vadd.f32 %v4651_v21, %v6187_v8  ;;  %v7032_v6 = vld [vmem:[#allocation16_spill] sm:$0xff]  ;;  %v3098_v48 = vpack.c.bf16 %v6256_v45, %v6237_v56 }
 0x173   : > { %v1420_v33 = vpop.f32.mrf.mxu1  ;;  %v1780_v34 = vpop.f32.mrf.mxu0  ;;  %v4112_v56 = vld [vmem:[%s5155_s25 + $0x16a] sm:$0xff] }
 0x174   : > { %v6418_v37 = vadd.f32 %v4707_v41, %v1567_v57  ;;  %v1565_v1 = vadd.f32 %v1420_v33, %v6191_v36  ;;  %v7034_v33 = vld [vmem:[#allocation19_spill] sm:$0xff] }
 0x175   : > { %v4654_v23 = vpop.f32.mrf.mxu1  ;;  %v4710_v50 = vpop.f32.mrf.mxu0  ;;  %4893 = vmatmul.mubr.bf16.gmra.mxu1 %v2735_v53  ;;  %4949 = vmatmul.mubr.bf16.gmra.mxu0 %v3095_v2  ;;  %v7033_v53 = vld [vmem:[#allocation15_spill] sm:$0xff] }
 0x176   : > { %v6421_v5 = vadd.f32 %v1780_v34, %v1565_v1  ;;  %v1570_v8 = vadd.f32 %v4654_v23, %v6206_v16  ;;  %4896 = vmatprep.mubr.bf16.mxu1 %v2736_v14  ;;  %4952 = vmatprep.mubr.bf16.mxu0 %v3096_v55  ;;  %v4111_v14 = vld [vmem:[%s5155_s25 + $0x162] sm:$0xff]  ;;  %v4176_v45 = vld [vmem:[%s5155_s25 + $0x16c] sm:$0xff] }
 0x177   : > { %v1433_v24 = vpop.f32.mrf.mxu1  ;;  %v1793_v44 = vpop.f32.mrf.mxu0  ;;  %v4113_v1 = vld [vmem:[%s5155_s25 + $0x172] sm:$0xff] }
 0x178   : > { %v6428_v18 = vadd.f32 %v4710_v50, %v1570_v8  ;;  %v1568_v36 = vadd.f32 %v1433_v24, %v6213_v25  ;;  %v4114_v8 = vld [vmem:[%s5155_s25 + $0x17a] sm:$0xff] }
 0x179   : > { %v4655_v32 = vpop.f32.mrf.mxu1  ;;  %v4711_v29 = vpop.f32.mrf.mxu0 }
 0x17a   : > { %v6433_v16 = vadd.f32 %v1793_v44, %v1568_v36  ;;  %v1571_v59 = vadd.f32 %v4655_v32, %v7032_v6  ;;  %v7035_v44 = vld [vmem:[#allocation30_spill] sm:$0xff]  ;;  %v2739_v32 = vpack.c.bf16 %v4112_v56, %v4111_v14 }
 0x17b   : > { %v1436_v21 = vpop.f32.mrf.mxu1  ;;  %v1796_v25 = vpop.f32.mrf.mxu0  ;;  %v4115_v14 = vld [vmem:[%s5155_s25 + $0x182] sm:$0xff] }
 0x17c   : > { %v6438_v41 = vadd.f32 %v4711_v29, %v1571_v59  ;;  %v1569_v2 = vadd.f32 %v1436_v21, %v7033_v53  ;;  %v7036_v29 = vld [vmem:[#allocation23_spill] sm:$0xff]  ;;  %v2740_v59 = vpack.c.bf16 %v4114_v8, %v4113_v1  ;;  %v7038_v53 = vld [vmem:[#allocation4_spill] sm:$0xff] }
 0x17d   : > { %v4658_v54 = vpop.f32.mrf.mxu1  ;;  %v4714_v57 = vpop.f32.mrf.mxu0  ;;  %4897 = vmatmul.mubr.bf16.gmra.mxu1 %v2737_v19  ;;  %4953 = vmatmul.mubr.bf16.gmra.mxu0 %v3097_v28  ;;  %v3099_v19 = vpack.c.bf16 %v4176_v45, %v7036_v29  ;;  %v7037_v28 = vld [vmem:[#allocation2_spill] sm:$0xff]  ;;  %v4116_v45 = vld [vmem:[%s5155_s25 + $0x18a] sm:$0xff] }
 0x17e   : > { %v6442_v55 = vadd.f32 %v1796_v25, %v1569_v2  ;;  %v1574_v34 = vadd.f32 %v4658_v54, %v7034_v33  ;;  %4900 = vmatprep.mubr.bf16.mxu1 %v2738_v62  ;;  %4956 = vmatprep.mubr.bf16.mxu0 %v3098_v48  ;;  %v3100_v62 = vpack.c.bf16 %v4178_v42, %v4177_v39  ;;  %v4179_v1 = vld [vmem:[%s5155_s25 + $0x184] sm:$0xff] }
 0x17f   : > { %v1449_v23 = vpop.f32.mrf.mxu1  ;;  %v1809_v50 = vpop.f32.mrf.mxu0 }
 0x180   : > { %v6451_v24 = vadd.f32 %v4714_v57, %v1574_v34  ;;  %v1572_v22 = vadd.f32 %v1449_v23, %v7035_v44  ;;  %v7039_v34 = vld [vmem:[#allocation3_spill] sm:$0xff] }
 0x181   : > { %v4659_v35 = vpop.f32.mrf.mxu1  ;;  %v4715_v36 = vpop.f32.mrf.mxu0  ;;  %v4180_v23 = vld [vmem:[%s5155_s25 + $0x18c] sm:$0xff]  ;;  %s4981_s25 = smul.u32 320, %s7047_s12 }
 0x182   : > { %v6455_v12 = vadd.f32 %v1809_v50, %v1572_v22  ;;  %v1575_v6 = vadd.f32 %v4659_v35, %v7037_v28  ;;  %v2741_v35 = vpack.c.bf16 %v4116_v45, %v4115_v14 }
 0x183   : > { %v1452_v48 = vpop.f32.mrf.mxu1  ;;  %v1812_v21 = vpop.f32.mrf.mxu0  ;;  %s6672_s12 = scalar_lea.vmem %s6802_s3, %s4981_s25 }
 0x184   : > { %v6458_v25 = vadd.f32 %v4715_v36, %v1575_v6  ;;  %v1573_v2 = vadd.f32 %v1452_v48, %v7038_v53  ;;  %v3101_v36 = vpack.c.bf16 %v4180_v23, %v4179_v1 }
 0x185   : > { %v4662_v54 = vpop.f32.mrf.mxu1  ;;  %v4718_v57 = vpop.f32.mrf.mxu0  ;;  %4901 = vmatmul.mubr.bf16.gmra.mxu1 %v2739_v32  ;;  %4957 = vmatmul.mubr.bf16.gmra.mxu0 %v3099_v19 }
 0x186   : > { %v6462_v33 = vadd.f32 %v1812_v21, %v1573_v2  ;;  %v1578_v56 = vadd.f32 %v4662_v54, %v7039_v34  ;;  %4904 = vmatprep.mubr.bf16.mxu1 %v2740_v59  ;;  %4960 = vmatprep.mubr.bf16.mxu0 %v3100_v62  ;;  %v7040_v59 = vld [vmem:[#allocation6_spill] sm:$0xff] }
 0x187   : > { %v1465_v50 = vpop.f32.mrf.mxu1  ;;  %v1825_v8 = vpop.f32.mrf.mxu0 }
 0x188   : > { %v6468_v39 = vadd.f32 %v4718_v57, %v1578_v56  ;;  %v1576_v42 = vadd.f32 %v1465_v50, %v6275_v40 }
 0x189   : > { %v4663_v44 = vpop.f32.mrf.mxu1  ;;  %v4719_v22 = vpop.f32.mrf.mxu0 }
 0x18a   : > { %v6471_v32 = vadd.f32 %v1825_v8, %v1576_v42  ;;  %v1579_v29 = vadd.f32 %v4663_v44, %v6278_v43 }
 0x18b   : > { %v1468_v19 = vpop.f32.mrf.mxu1  ;;  %v1828_v28 = vpop.f32.mrf.mxu0 }
 0x18c   : > { %v6474_v6 = vadd.f32 %v4719_v22, %v1579_v29  ;;  %v1577_v62 = vadd.f32 %v1468_v19, %v7040_v59 }
 0x18d   : > { %v4666_v48 = vpop.f32.mrf.mxu1  ;;  %v4722_v21 = vpop.f32.mrf.mxu0  ;;  %4905 = vmatmul.mubr.bf16.gmra.mxu1 %v2741_v35  ;;  %4961 = vmatmul.mubr.bf16.gmra.mxu0 %v3101_v36 }
 0x18e   : > { %v6477_v53 = vadd.f32 %v1828_v28, %v1577_v62  ;;  %v1582_v40 = vadd.f32 %v4666_v48, %v6292_v52 }
 0x18f   : > { %v1481_v2 = vpop.f32.mrf.mxu1  ;;  %v1841_v54 = vpop.f32.mrf.mxu0 }
 0x190   : > { %v6480_v57 = vadd.f32 %v4722_v21, %v1582_v40  ;;  %v1580_v43 = vadd.f32 %v1481_v2, %v6295_v11 }
 0x191   : > { %v4667_v14 = vpop.f32.mrf.mxu1  ;;  %v4723_v34 = vpop.f32.mrf.mxu0 }
 0x192   : > { %v6483_v56 = vadd.f32 %v1841_v54, %v1580_v43  ;;  %v1583_v45 = vadd.f32 %v4667_v14, %v6298_v46 }
 0x193   : > { %v1484_v1 = vpop.f32.mrf.mxu1  ;;  %v1844_v23 = vpop.f32.mrf.mxu0 }
 0x194   : > { %v6486_v50 = vadd.f32 %v4723_v34, %v1583_v45  ;;  %v1581_v8 = vadd.f32 %v1484_v1, %v6303_v47 }
 0x195   : > { %v4670_v42 = vpop.f32.mrf.mxu1  ;;  %v4726_v52 = vpop.f32.mrf.mxu0 }
 0x196   : > { %v6489_v44 = vadd.f32 %v1844_v23, %v1581_v8  ;;  %v1586_v22 = vadd.f32 %v4670_v42, %v6312_v3 }
 0x197   : > { %v1497_v35 = vpop.f32.mrf.mxu1  ;;  %v1857_v11 = vpop.f32.mrf.mxu0 }
 0x198   : > { %v6492_v36 = vadd.f32 %v4726_v52, %v1586_v22  ;;  %v1584_v29 = vadd.f32 %v1497_v35, %v6315_v10  ;;  %v7041_v52 = vld [vmem:[#allocation5_spill] sm:$0xff] }
 0x199   : > { %v4671_v19 = vpop.f32.mrf.mxu1  ;;  %v4727_v46 = vpop.f32.mrf.mxu0 }
 0x19a   : > { %v6495_v28 = vadd.f32 %v1857_v11, %v1584_v29  ;;  %v1587_v59 = vadd.f32 %v4671_v19, %v6318_v38 }
 0x19b   : > { %v1500_v62 = vpop.f32.mrf.mxu1  ;;  %v1860_v47 = vpop.f32.mrf.mxu0 }
 0x19c   : > { %v6498_v48 = vadd.f32 %v4727_v46, %v1587_v59  ;;  %v1585_v21 = vadd.f32 %v1500_v62, %v6323_v63 }
 0x19d   : > { %v4674_v40 = vpop.f32.mrf.mxu1  ;;  %v4730_v3 = vpop.f32.mrf.mxu0 }
 0x19e   : > { %v6501_v2 = vadd.f32 %v1860_v47, %v1585_v21  ;;  %v1590_v54 = vadd.f32 %v4674_v40, %v6332_v17 }
 0x19f   : > { %v1513_v43 = vpop.f32.mrf.mxu1  ;;  %v1873_v10 = vpop.f32.mrf.mxu0 }
 0x1a0   : > { %v6504_v14 = vadd.f32 %v4730_v3, %v1590_v54  ;;  %v1588_v34 = vadd.f32 %v1513_v43, %v6335_v60 }
 0x1a1   : > { %v4675_v45 = vpop.f32.mrf.mxu1  ;;  %v4731_v38 = vpop.f32.mrf.mxu0 }
 0x1a2   : > { %v6507_v1 = vadd.f32 %v1873_v10, %v1588_v34  ;;  %v1591_v23 = vadd.f32 %v4675_v45, %v6338_v13 }
 0x1a3   : > { %v1516_v8 = vpop.f32.mrf.mxu1  ;;  %v1876_v63 = vpop.f32.mrf.mxu0 }
 0x1a4   : > { %v6510_v42 = vadd.f32 %v4731_v38, %v1591_v23  ;;  %v1589_v22 = vadd.f32 %v1516_v8, %v7041_v52 }
 0x1a5   : > { %v4678_v35 = vpop.f32.mrf.mxu1  ;;  %v4734_v17 = vpop.f32.mrf.mxu0 }
 0x1a6   : > { %v6513_v11 = vadd.f32 %v1876_v63, %v1589_v22  ;;  %v1594_v29 = vadd.f32 %v4678_v35, %v6352_v20 }
 0x1a7   : > { %v1529_v19 = vpop.f32.mrf.mxu1  ;;  %v1889_v60 = vpop.f32.mrf.mxu0 }
 0x1a8   : > { %v6516_v46 = vadd.f32 %v4734_v17, %v1594_v29  ;;  %v1592_v59 = vadd.f32 %v1529_v19, %v6355_v58 }
 0x1a9   : > { %v4679_v62 = vpop.f32.mrf.mxu1  ;;  %v4735_v13 = vpop.f32.mrf.mxu0 }
 0x1aa   : > { %v6519_v47 = vadd.f32 %v1889_v60, %v1592_v59  ;;  %v1595_v21 = vadd.f32 %v4679_v62, %v6358_v15 }
 0x1ab   : > { %v1532_v40 = vpop.f32.mrf.mxu1  ;;  %v1892_v3 = vpop.f32.mrf.mxu0 }
 0x1ac   : > { %v6522_v54 = vadd.f32 %v4735_v13, %v1595_v21  ;;  %v1593_v43 = vadd.f32 %v1532_v40, %v6361_v61 }
 0x1ad   : > { %v4682_v10 = vpop.f32.mrf.mxu1  ;;  %v4738_v20 = vpop.f32.mrf.mxu0 }
 0x1ae   : > { %v6525_v34 = vadd.f32 %v1892_v3, %v1593_v43  ;;  %v1598_v45 = vadd.f32 %v4682_v10, %v6369_v30 }
 0x1af   : > { %v1545_v38 = vpop.f32.mrf.mxu1  ;;  %v1905_v58 = vpop.f32.mrf.mxu0 }
 0x1b0   : > { %v6528_v23 = vadd.f32 %v4738_v20, %v1598_v45  ;;  %v1596_v8 = vadd.f32 %v1545_v38, %v6373_v27 }
 0x1b1   : > { %v4683_v63 = vpop.f32.mrf.mxu1  ;;  %v4739_v15 = vpop.f32.mrf.mxu0 }
 0x1b2   : > { %v6531_v52 = vadd.f32 %v1905_v58, %v1596_v8  ;;  %v1599_v22 = vadd.f32 %v4683_v63, %v6378_v49 }
 0x1b3   : > { %v1548_v35 = vpop.f32.mrf.mxu1  ;;  %v1908_v61 = vpop.f32.mrf.mxu0 }
 0x1b4   : > { %v6534_v17 = vadd.f32 %v4739_v15, %v1599_v22  ;;  %v1597_v29 = vadd.f32 %v1548_v35, %v6381_v31 }
 0x1b5   : > { %v4758_v19 = vpop.f32.mrf.mxu1  ;;  %v4814_v30 = vpop.f32.mrf.mxu0 }
 0x1b6   : > { %v6537_v60 = vadd.f32 %v1908_v61, %v1597_v29  ;;  %v2282_v59 = vadd.f32 %v4758_v19, %v6389_v0 }
 0x1b7   : > { %v2121_v62 = vpop.f32.mrf.mxu1  ;;  %v2481_v27 = vpop.f32.mrf.mxu0 }
 0x1b8   : > { %v6540_v13 = vadd.f32 %v4814_v30, %v2282_v59  ;;  %v2280_v21 = vadd.f32 %v2121_v62, %v6393_v9 }
 0x1b9   : > { %v4759_v40 = vpop.f32.mrf.mxu1  ;;  %v4815_v49 = vpop.f32.mrf.mxu0 }
 0x1ba   : > { %v6543_v3 = vadd.f32 %v2481_v27, %v2280_v21  ;;  %v2283_v43 = vadd.f32 %v4759_v40, %v6398_v26 }
 0x1bb   : > { %v2124_v10 = vpop.f32.mrf.mxu1  ;;  %v2484_v31 = vpop.f32.mrf.mxu0 }
 0x1bc   : > { %v6546_v20 = vadd.f32 %v4815_v49, %v2283_v43  ;;  %v2281_v45 = vadd.f32 %v2124_v10, %v6401_v7 }
 0x1bd   : > { %v4762_v38 = vpop.f32.mrf.mxu1  ;;  %v4818_v0 = vpop.f32.mrf.mxu0 }
 0x1be   : > { %v6549_v58 = vadd.f32 %v2484_v31, %v2281_v45  ;;  %v2286_v8 = vadd.f32 %v4762_v38, %v6408_v4 }
 0x1bf   : > { %v2137_v63 = vpop.f32.mrf.mxu1  ;;  %v2497_v9 = vpop.f32.mrf.mxu0 }
 0x1c0   : > { %v6552_v15 = vadd.f32 %v4818_v0, %v2286_v8  ;;  %v2284_v22 = vadd.f32 %v2137_v63, %v6413_v51 }
 0x1c1   : > { %v4763_v35 = vpop.f32.mrf.mxu1  ;;  %v4819_v26 = vpop.f32.mrf.mxu0 }
 0x1c2   : > { %v6555_v61 = vadd.f32 %v2497_v9, %v2284_v22  ;;  %v2287_v29 = vadd.f32 %v4763_v35, %v6418_v37 }
 0x1c3   : > { %v2140_v19 = vpop.f32.mrf.mxu1  ;;  %v2500_v7 = vpop.f32.mrf.mxu0 }
 0x1c4   : > { %v6558_v30 = vadd.f32 %v4819_v26, %v2287_v29  ;;  %v2285_v59 = vadd.f32 %v2140_v19, %v6421_v5 }
 0x1c5   : > { %v4766_v62 = vpop.f32.mrf.mxu1  ;;  %v4822_v4 = vpop.f32.mrf.mxu0 }
 0x1c6   : > { %v6561_v27 = vadd.f32 %v2500_v7, %v2285_v59  ;;  %v2290_v21 = vadd.f32 %v4766_v62, %v6428_v18 }
 0x1c7   : > { %v2153_v40 = vpop.f32.mrf.mxu1  ;;  %v2513_v51 = vpop.f32.mrf.mxu0 }
 0x1c8   : > { %v6564_v49 = vadd.f32 %v4822_v4, %v2290_v21  ;;  %v2288_v43 = vadd.f32 %v2153_v40, %v6433_v16 }
 0x1c9   : > { %v4767_v10 = vpop.f32.mrf.mxu1  ;;  %v4823_v37 = vpop.f32.mrf.mxu0 }
 0x1ca   : > { %v6567_v31 = vadd.f32 %v2513_v51, %v2288_v43  ;;  %v2291_v45 = vadd.f32 %v4767_v10, %v6438_v41 }
 0x1cb   : > { %v2156_v38 = vpop.f32.mrf.mxu1  ;;  %v2516_v5 = vpop.f32.mrf.mxu0 }
 0x1cc   : > { %v6570_v0 = vadd.f32 %v4823_v37, %v2291_v45  ;;  %v2289_v8 = vadd.f32 %v2156_v38, %v6442_v55 }
 0x1cd   : > { %v4770_v63 = vpop.f32.mrf.mxu1  ;;  %v4826_v18 = vpop.f32.mrf.mxu0 }
 0x1ce   : > { %v6573_v9 = vadd.f32 %v2516_v5, %v2289_v8  ;;  %v2294_v22 = vadd.f32 %v4770_v63, %v6451_v24 }
 0x1cf   : > { %v2169_v35 = vpop.f32.mrf.mxu1  ;;  %v2529_v16 = vpop.f32.mrf.mxu0 }
 0x1d0   : > { %v6576_v26 = vadd.f32 %v4826_v18, %v2294_v22  ;;  %v2292_v29 = vadd.f32 %v2169_v35, %v6455_v12 }
 0x1d1   : > { %v4771_v19 = vpop.f32.mrf.mxu1  ;;  %v4827_v41 = vpop.f32.mrf.mxu0 }
 0x1d2   : > { %v6579_v7 = vadd.f32 %v2529_v16, %v2292_v29  ;;  %v2295_v59 = vadd.f32 %v4771_v19, %v6458_v25 }
 0x1d3   : > { %v2172_v62 = vpop.f32.mrf.mxu1  ;;  %v2532_v55 = vpop.f32.mrf.mxu0 }
 0x1d4   : > { %v6582_v4 = vadd.f32 %v4827_v41, %v2295_v59  ;;  %v2293_v21 = vadd.f32 %v2172_v62, %v6462_v33 }
 0x1d5   : > { %v4774_v40 = vpop.f32.mrf.mxu1  ;;  %v4830_v24 = vpop.f32.mrf.mxu0 }
 0x1d6   : > { %v6585_v51 = vadd.f32 %v2532_v55, %v2293_v21  ;;  %v2298_v43 = vadd.f32 %v4774_v40, %v6468_v39 }
 0x1d7   : > { %v2185_v10 = vpop.f32.mrf.mxu1  ;;  %v2545_v12 = vpop.f32.mrf.mxu0 }
 0x1d8   : > { %v6588_v37 = vadd.f32 %v4830_v24, %v2298_v43  ;;  %v2296_v45 = vadd.f32 %v2185_v10, %v6471_v32 }
 0x1d9   : > { %v4775_v38 = vpop.f32.mrf.mxu1  ;;  %v4831_v25 = vpop.f32.mrf.mxu0 }
 0x1da   : > { %v6591_v5 = vadd.f32 %v2545_v12, %v2296_v45  ;;  %v2299_v8 = vadd.f32 %v4775_v38, %v6474_v6 }
 0x1db   : > { %v2188_v63 = vpop.f32.mrf.mxu1  ;;  %v2548_v33 = vpop.f32.mrf.mxu0 }
 0x1dc   : > { %v6594_v18 = vadd.f32 %v4831_v25, %v2299_v8  ;;  %v2297_v22 = vadd.f32 %v2188_v63, %v6477_v53 }
 0x1dd   : > { %v4778_v35 = vpop.f32.mrf.mxu1  ;;  %v4834_v39 = vpop.f32.mrf.mxu0 }
 0x1de   : > { %v6597_v16 = vadd.f32 %v2548_v33, %v2297_v22  ;;  %v2302_v29 = vadd.f32 %v4778_v35, %v6480_v57 }
 0x1df   : > { %v2201_v19 = vpop.f32.mrf.mxu1  ;;  %v2561_v32 = vpop.f32.mrf.mxu0 }
 0x1e0   : > { %v6600_v41 = vadd.f32 %v4834_v39, %v2302_v29  ;;  %v2300_v59 = vadd.f32 %v2201_v19, %v6483_v56 }
 0x1e1   : > { %v4779_v62 = vpop.f32.mrf.mxu1  ;;  %v4835_v6 = vpop.f32.mrf.mxu0 }
 0x1e2   : > { %v6603_v55 = vadd.f32 %v2561_v32, %v2300_v59  ;;  %v2303_v21 = vadd.f32 %v4779_v62, %v6486_v50 }
 0x1e3   : > { %v2204_v40 = vpop.f32.mrf.mxu1  ;;  %v2564_v53 = vpop.f32.mrf.mxu0 }
 0x1e4   : > { %v6606_v24 = vadd.f32 %v4835_v6, %v2303_v21  ;;  %v2301_v43 = vadd.f32 %v2204_v40, %v6489_v44 }
 0x1e5   : > { %v4782_v10 = vpop.f32.mrf.mxu1  ;;  %v4838_v57 = vpop.f32.mrf.mxu0 }
 0x1e6   : > { %v6609_v12 = vadd.f32 %v2564_v53, %v2301_v43  ;;  %v2306_v45 = vadd.f32 %v4782_v10, %v6492_v36 }
 0x1e7   : > { %v2217_v38 = vpop.f32.mrf.mxu1  ;;  %v2577_v56 = vpop.f32.mrf.mxu0 }
 0x1e8   : > { %v6612_v25 = vadd.f32 %v4838_v57, %v2306_v45  ;;  %v2304_v8 = vadd.f32 %v2217_v38, %v6495_v28 }
 0x1e9   : > { %v4783_v63 = vpop.f32.mrf.mxu1  ;;  %v4839_v50 = vpop.f32.mrf.mxu0 }
 0x1ea   : > { %v6615_v33 = vadd.f32 %v2577_v56, %v2304_v8  ;;  %v2307_v22 = vadd.f32 %v4783_v63, %v6498_v48 }
 0x1eb   : > { %v2220_v35 = vpop.f32.mrf.mxu1  ;;  %v2580_v44 = vpop.f32.mrf.mxu0 }
 0x1ec   : > { %v6618_v39 = vadd.f32 %v4839_v50, %v2307_v22  ;;  %v2305_v29 = vadd.f32 %v2220_v35, %v6501_v2 }
 0x1ed   : > { %v4786_v19 = vpop.f32.mrf.mxu1  ;;  %v4842_v36 = vpop.f32.mrf.mxu0 }
 0x1ee   : > { %v6621_v32 = vadd.f32 %v2580_v44, %v2305_v29  ;;  %v2310_v59 = vadd.f32 %v4786_v19, %v6504_v14 }
 0x1ef   : > { %v2233_v62 = vpop.f32.mrf.mxu1  ;;  %v2593_v28 = vpop.f32.mrf.mxu0 }
 0x1f0   : > { %v6624_v6 = vadd.f32 %v4842_v36, %v2310_v59  ;;  %v2308_v21 = vadd.f32 %v2233_v62, %v6507_v1 }
 0x1f1   : > { %v4787_v40 = vpop.f32.mrf.mxu1  ;;  %v4843_v48 = vpop.f32.mrf.mxu0 }
 0x1f2   : > { %v6627_v53 = vadd.f32 %v2593_v28, %v2308_v21  ;;  %v2311_v43 = vadd.f32 %v4787_v40, %v6510_v42 }
 0x1f3   : > { %v2236_v10 = vpop.f32.mrf.mxu1  ;;  %v2596_v2 = vpop.f32.mrf.mxu0 }
 0x1f4   : > { %v6630_v57 = vadd.f32 %v4843_v48, %v2311_v43  ;;  %v2309_v45 = vadd.f32 %v2236_v10, %v6513_v11 }
 0x1f5   : > { %v4790_v38 = vpop.f32.mrf.mxu1  ;;  %v4846_v14 = vpop.f32.mrf.mxu0 }
 0x1f6   : > { %v6633_v56 = vadd.f32 %v2596_v2, %v2309_v45  ;;  %v2314_v8 = vadd.f32 %v4790_v38, %v6516_v46 }
 0x1f7   : > { %v2249_v63 = vpop.f32.mrf.mxu1  ;;  %v2609_v1 = vpop.f32.mrf.mxu0 }
 0x1f8   : > { %v6636_v50 = vadd.f32 %v4846_v14, %v2314_v8  ;;  %v2312_v22 = vadd.f32 %v2249_v63, %v6519_v47 }
 0x1f9   : > { %v4791_v35 = vpop.f32.mrf.mxu1  ;;  %v4847_v42 = vpop.f32.mrf.mxu0 }
 0x1fa   : > { %v6639_v44 = vadd.f32 %v2609_v1, %v2312_v22  ;;  %v2315_v29 = vadd.f32 %v4791_v35, %v6522_v54 }
 0x1fb   : > { %v2252_v19 = vpop.f32.mrf.mxu1  ;;  %v2612_v11 = vpop.f32.mrf.mxu0 }
 0x1fc   : > { %v6642_v36 = vadd.f32 %v4847_v42, %v2315_v29  ;;  %v2313_v59 = vadd.f32 %v2252_v19, %v6525_v34 }
 0x1fd   : > { %v4794_v62 = vpop.f32.mrf.mxu1  ;;  %v4850_v46 = vpop.f32.mrf.mxu0 }
 0x1fe   : > { %v6645_v28 = vadd.f32 %v2612_v11, %v2313_v59  ;;  %v2318_v21 = vadd.f32 %v4794_v62, %v6528_v23 }
 0x1ff   : > { %v2265_v40 = vpop.f32.mrf.mxu1  ;;  %v2625_v47 = vpop.f32.mrf.mxu0 }
 0x200   : > { %v6648_v48 = vadd.f32 %v4850_v46, %v2318_v21  ;;  %v2316_v43 = vadd.f32 %v2265_v40, %v6531_v52  ;;  %v6664_v52 = vld [vmem:[%s6801_s2] ss:$0 sm:$0xff] }
 0x201   : > { %v4795_v54 = vpop.f32.mrf.mxu1  ;;  %v4851_v10 = vpop.f32.mrf.mxu0 }
 0x202   : > { %v6651_v2 = vadd.f32 %v2625_v47, %v2316_v43  ;;  %v2319_v45 = vadd.f32 %v4795_v54, %v6534_v17 }
 0x203   : > { %v2268_v34 = vpop.f32.mrf.mxu1  ;;  %v2628_v38 = vpop.f32.mrf.mxu0 }
 0x204   : > { %v6654_v14 = vadd.f32 %v4851_v10, %v2319_v45  ;;  %v2317_v8 = vadd.f32 %v2268_v34, %v6537_v60 }
 0x205   : > { %v4870_v23 = vpop.f32.mrf.mxu1  ;;  %v4926_v63 = vpop.f32.mrf.mxu0 }
 0x206   : > { %v6657_v1 = vadd.f32 %v2628_v38, %v2317_v8  ;;  %v3002_v22 = vadd.f32 %v4870_v23, %v6540_v13 }
 0x207   : > { %v2841_v35 = vpop.f32.mrf.mxu1  ;;  %v3201_v17 = vpop.f32.mrf.mxu0 }
 0x208   : > { %v3362_v42 = vadd.f32 %v4926_v63, %v3002_v22  ;;  %v3000_v29 = vadd.f32 %v2841_v35, %v6543_v3 }
 0x209   : > { %v4871_v19 = vpop.f32.mrf.mxu1  ;;  %v4927_v11 = vpop.f32.mrf.mxu0 }
 0x20a   : > { %v3409_v60 = vadd.f32 %v6664_v52, %v3362_v42  ;;  %v3360_v59 = vadd.f32 %v3201_v17, %v3000_v29  ;;  %v3003_v62 = vadd.f32 %v4871_v19, %v6546_v20 }
 0x20b   : > { %v2844_v13 = vpop.f32.mrf.mxu1  ;;  %v3204_v46 = vpop.f32.mrf.mxu0 }
 0x20c   : > { %v3449_v21 = vmax.f32 %v3409_v60, 0.0  ;;  %v3407_v40 = vadd.f32 %v6664_v52, %v3360_v59  ;;  %v3363_v3 = vadd.f32 %v4927_v11, %v3003_v62  ;;  %v3001_v47 = vadd.f32 %v2844_v13, %v6549_v58 }
 0x20d   : > { %v4874_v43 = vpop.f32.mrf.mxu1  ;;  %v4930_v54 = vpop.f32.mrf.mxu0 }
 0x20e   : > { %3489 = vst [vmem:[%s6672_s12 + $0x10] sm:$0xff] %v3449_v21  ;;  %v3447_v20 = vmax.f32 %v3407_v40, 0.0  ;;  %v3410_v10 = vadd.f32 %v6664_v52, %v3363_v3  ;;  %v3361_v45 = vadd.f32 %v3204_v46, %v3001_v47  ;;  %v3006_v34 = vadd.f32 %v4874_v43, %v6552_v15 }
 0x20f   : > { %v2857_v38 = vpop.f32.mrf.mxu1  ;;  %v3217_v8 = vpop.f32.mrf.mxu0 }
 0x210   : > { %3487 = vst [vmem:[%s6672_s12] sm:$0xff] %v3447_v20  ;;  %v3450_v23 = vmax.f32 %v3410_v10, 0.0  ;;  %v3408_v63 = vadd.f32 %v6664_v52, %v3361_v45  ;;  %v3366_v22 = vadd.f32 %v4930_v54, %v3006_v34  ;;  %v3004_v58 = vadd.f32 %v2857_v38, %v6555_v61 }
 0x211   : > { %v4875_v35 = vpop.f32.mrf.mxu1  ;;  %v4931_v17 = vpop.f32.mrf.mxu0 }
 0x212   : > { %3490 = vst [vmem:[%s6672_s12 + $0x18] sm:$0xff] %v3450_v23  ;;  %v3448_v42 = vmax.f32 %v3408_v63, 0.0  ;;  %v3413_v29 = vadd.f32 %v6664_v52, %v3366_v22  ;;  %v3364_v19 = vadd.f32 %v3217_v8, %v3004_v58  ;;  %v3007_v15 = vadd.f32 %v4875_v35, %v6558_v30 }
 0x213   : > { %v2860_v11 = vpop.f32.mrf.mxu1  ;;  %v3220_v60 = vpop.f32.mrf.mxu0 }
 0x214   : > { %3488 = vst [vmem:[%s6672_s12 + $0x8] sm:$0xff] %v3448_v42  ;;  %v3453_v59 = vmax.f32 %v3413_v29, 0.0  ;;  %v3411_v62 = vadd.f32 %v6664_v52, %v3364_v19  ;;  %v3367_v13 = vadd.f32 %v4931_v17, %v3007_v15  ;;  %v3005_v61 = vadd.f32 %v2860_v11, %v6561_v27 }
 0x215   : > { %v4878_v46 = vpop.f32.mrf.mxu1  ;;  %v4934_v21 = vpop.f32.mrf.mxu0 }
 0x216   : > { %3493 = vst [vmem:[%s6672_s12 + $0x30] sm:$0xff] %v3453_v59  ;;  %v3451_v40 = vmax.f32 %v3411_v62, 0.0  ;;  %v3414_v3 = vadd.f32 %v6664_v52, %v3367_v13  ;;  %v3365_v47 = vadd.f32 %v3220_v60, %v3005_v61  ;;  %v3010_v30 = vadd.f32 %v4878_v46, %v6564_v49 }
 0x217   : > { %v2873_v43 = vpop.f32.mrf.mxu1  ;;  %v3233_v54 = vpop.f32.mrf.mxu0 }
 0x218   : > { %3491 = vst [vmem:[%s6672_s12 + $0x20] sm:$0xff] %v3451_v40  ;;  %v3454_v20 = vmax.f32 %v3414_v3, 0.0  ;;  %v3412_v10 = vadd.f32 %v6664_v52, %v3365_v47  ;;  %v3370_v45 = vadd.f32 %v4934_v21, %v3010_v30  ;;  %v3008_v27 = vadd.f32 %v2873_v43, %v6567_v31 }
 0x219   : > { %v4879_v34 = vpop.f32.mrf.mxu1  ;;  %v4935_v38 = vpop.f32.mrf.mxu0 }
 0x21a   : > { %3494 = vst [vmem:[%s6672_s12 + $0x38] sm:$0xff] %v3454_v20  ;;  %v3452_v8 = vmax.f32 %v3412_v10, 0.0  ;;  %v3417_v23 = vadd.f32 %v6664_v52, %v3370_v45  ;;  %v3368_v63 = vadd.f32 %v3233_v54, %v3008_v27  ;;  %v3011_v49 = vadd.f32 %v4879_v34, %v6570_v0 }
 0x21b   : > { %v2876_v22 = vpop.f32.mrf.mxu1  ;;  %v3236_v58 = vpop.f32.mrf.mxu0 }
 0x21c   : > { %3492 = vst [vmem:[%s6672_s12 + $0x28] sm:$0xff] %v3452_v8  ;;  %v3457_v35 = vmax.f32 %v3417_v23, 0.0  ;;  %v3415_v17 = vadd.f32 %v6664_v52, %v3368_v63  ;;  %v3371_v42 = vadd.f32 %v4935_v38, %v3011_v49  ;;  %v3009_v31 = vadd.f32 %v2876_v22, %v6573_v9 }
 0x21d   : > { %v4882_v29 = vpop.f32.mrf.mxu1  ;;  %v4938_v19 = vpop.f32.mrf.mxu0 }
 0x21e   : > { %3497 = vst [vmem:[%s6672_s12 + $0x50] sm:$0xff] %v3457_v35  ;;  %v3455_v15 = vmax.f32 %v3415_v17, 0.0  ;;  %v3418_v11 = vadd.f32 %v6664_v52, %v3371_v42  ;;  %v3369_v60 = vadd.f32 %v3236_v58, %v3009_v31  ;;  %v3014_v0 = vadd.f32 %v4882_v29, %v6576_v26 }
 0x21f   : > { %v2889_v59 = vpop.f32.mrf.mxu1  ;;  %v3249_v62 = vpop.f32.mrf.mxu0 }
 0x220   : > { %3495 = vst [vmem:[%s6672_s12 + $0x40] sm:$0xff] %v3455_v15  ;;  %v3458_v13 = vmax.f32 %v3418_v11, 0.0  ;;  %v3416_v61 = vadd.f32 %v6664_v52, %v3369_v60  ;;  %v3374_v46 = vadd.f32 %v4938_v19, %v3014_v0  ;;  %v3012_v9 = vadd.f32 %v2889_v59, %v6579_v7 }
 0x221   : > { %v4883_v21 = vpop.f32.mrf.mxu1  ;;  %v4939_v40 = vpop.f32.mrf.mxu0 }
 0x222   : > { %3498 = vst [vmem:[%s6672_s12 + $0x58] sm:$0xff] %v3458_v13  ;;  %v3456_v3 = vmax.f32 %v3416_v61, 0.0  ;;  %v3421_v47 = vadd.f32 %v6664_v52, %v3374_v46  ;;  %v3372_v30 = vadd.f32 %v3249_v62, %v3012_v9  ;;  %v3015_v26 = vadd.f32 %v4883_v21, %v6582_v4 }
 0x223   : > { %v2892_v43 = vpop.f32.mrf.mxu1  ;;  %v3252_v54 = vpop.f32.mrf.mxu0 }
 0x224   : > { %3496 = vst [vmem:[%s6672_s12 + $0x48] sm:$0xff] %v3456_v3  ;;  %v3461_v20 = vmax.f32 %v3421_v47, 0.0  ;;  %v3419_v10 = vadd.f32 %v6664_v52, %v3372_v30  ;;  %v3375_v45 = vadd.f32 %v4939_v40, %v3015_v26  ;;  %v3013_v7 = vadd.f32 %v2892_v43, %v6585_v51 }
 0x225   : > { %v4886_v27 = vpop.f32.mrf.mxu1  ;;  %v4942_v34 = vpop.f32.mrf.mxu0 }
 0x226   : > { %3501 = vst [vmem:[%s6672_s12 + $0x70] sm:$0xff] %v3461_v20  ;;  %v3459_v38 = vmax.f32 %v3419_v10, 0.0  ;;  %v3422_v8 = vadd.f32 %v6664_v52, %v3375_v45  ;;  %v3373_v23 = vadd.f32 %v3252_v54, %v3013_v7  ;;  %v3018_v4 = vadd.f32 %v4886_v27, %v6588_v37 }
 0x227   : > { %v2905_v63 = vpop.f32.mrf.mxu1  ;;  %v3265_v49 = vpop.f32.mrf.mxu0 }
 0x228   : > { %3499 = vst [vmem:[%s6672_s12 + $0x60] sm:$0xff] %v3459_v38  ;;  %v3462_v22 = vmax.f32 %v3422_v8, 0.0  ;;  %v3420_v58 = vadd.f32 %v6664_v52, %v3373_v23  ;;  %v3378_v35 = vadd.f32 %v4942_v34, %v3018_v4  ;;  %v3016_v51 = vadd.f32 %v2905_v63, %v6591_v5 }
 0x229   : > { %v4887_v17 = vpop.f32.mrf.mxu1  ;;  %v4943_v42 = vpop.f32.mrf.mxu0 }
 0x22a   : > { %3502 = vst [vmem:[%s6672_s12 + $0x78] sm:$0xff] %v3462_v22  ;;  %v3460_v31 = vmax.f32 %v3420_v58, 0.0  ;;  %v3425_v29 = vadd.f32 %v6664_v52, %v3378_v35  ;;  %v3376_v19 = vadd.f32 %v3265_v49, %v3016_v51  ;;  %v3019_v37 = vadd.f32 %v4887_v17, %v6594_v18 }
 0x22b   : > { %v2908_v15 = vpop.f32.mrf.mxu1  ;;  %v3268_v11 = vpop.f32.mrf.mxu0 }
 0x22c   : > { %3500 = vst [vmem:[%s6672_s12 + $0x68] sm:$0xff] %v3460_v31  ;;  %v3465_v60 = vmax.f32 %v3425_v29, 0.0  ;;  %v3423_v0 = vadd.f32 %v6664_v52, %v3376_v19  ;;  %v3379_v59 = vadd.f32 %v4943_v42, %v3019_v37  ;;  %v3017_v5 = vadd.f32 %v2908_v15, %v6597_v16 }
 0x22d   : > { %v4890_v62 = vpop.f32.mrf.mxu1  ;;  %v4946_v13 = vpop.f32.mrf.mxu0 }
 0x22e   : > { %3505 = vst [vmem:[%s6672_s12 + $0x90] sm:$0xff] %v3465_v60  ;;  %v3463_v61 = vmax.f32 %v3423_v0, 0.0  ;;  %v3426_v46 = vadd.f32 %v6664_v52, %v3379_v59  ;;  %v3377_v9 = vadd.f32 %v3268_v11, %v3017_v5  ;;  %v3022_v18 = vadd.f32 %v4890_v62, %v6600_v41 }
 0x22f   : > { %v2921_v21 = vpop.f32.mrf.mxu1  ;;  %v3281_v40 = vpop.f32.mrf.mxu0 }
 0x230   : > { %3503 = vst [vmem:[%s6672_s12 + $0x80] sm:$0xff] %v3463_v61  ;;  %v3466_v3 = vmax.f32 %v3426_v46, 0.0  ;;  %v3424_v47 = vadd.f32 %v6664_v52, %v3377_v9  ;;  %v3382_v30 = vadd.f32 %v4946_v13, %v3022_v18  ;;  %v3020_v16 = vadd.f32 %v2921_v21, %v6603_v55 }
 0x231   : > { %v4891_v26 = vpop.f32.mrf.mxu1  ;;  %v4947_v43 = vpop.f32.mrf.mxu0 }
 0x232   : > { %3506 = vst [vmem:[%s6672_s12 + $0x98] sm:$0xff] %v3466_v3  ;;  %v3464_v54 = vmax.f32 %v3424_v47, 0.0  ;;  %v3429_v20 = vadd.f32 %v6664_v52, %v3382_v30  ;;  %v3380_v10 = vadd.f32 %v3281_v40, %v3020_v16  ;;  %v3023_v41 = vadd.f32 %v4891_v26, %v6606_v24 }
 0x233   : > { %v2924_v45 = vpop.f32.mrf.mxu1  ;;  %v3284_v7 = vpop.f32.mrf.mxu0 }
 0x234   : > { %3504 = vst [vmem:[%s6672_s12 + $0x88] sm:$0xff] %v3464_v54  ;;  %v3469_v27 = vmax.f32 %v3429_v20, 0.0  ;;  %v3427_v34 = vadd.f32 %v6664_v52, %v3380_v10  ;;  %v3383_v38 = vadd.f32 %v4947_v43, %v3023_v41  ;;  %v3021_v55 = vadd.f32 %v2924_v45, %v6609_v12 }
 0x235   : > { %v4894_v8 = vpop.f32.mrf.mxu1  ;;  %v4950_v23 = vpop.f32.mrf.mxu0 }
 0x236   : > { %3509 = vst [vmem:[%s6672_s12 + $0xb0] sm:$0xff] %v3469_v27  ;;  %v3467_v4 = vmax.f32 %v3427_v34, 0.0  ;;  %v3430_v63 = vadd.f32 %v6664_v52, %v3383_v38  ;;  %v3381_v49 = vadd.f32 %v3284_v7, %v3021_v55  ;;  %v3026_v24 = vadd.f32 %v4894_v8, %v6612_v25 }
 0x237   : > { %v2937_v22 = vpop.f32.mrf.mxu1  ;;  %v3297_v58 = vpop.f32.mrf.mxu0 }
 0x238   : > { %3507 = vst [vmem:[%s6672_s12 + $0xa0] sm:$0xff] %v3467_v4  ;;  %v3470_v35 = vmax.f32 %v3430_v63, 0.0  ;;  %v3428_v51 = vadd.f32 %v6664_v52, %v3381_v49  ;;  %v3386_v17 = vadd.f32 %v4950_v23, %v3026_v24  ;;  %v3024_v12 = vadd.f32 %v2937_v22, %v6615_v33 }
 0x239   : > { %v4895_v42 = vpop.f32.mrf.mxu1  ;;  %v4951_v31 = vpop.f32.mrf.mxu0 }
 0x23a   : > { %3510 = vst [vmem:[%s6672_s12 + $0xb8] sm:$0xff] %v3470_v35  ;;  %v3468_v29 = vmax.f32 %v3428_v51, 0.0  ;;  %v3433_v19 = vadd.f32 %v6664_v52, %v3386_v17  ;;  %v3384_v37 = vadd.f32 %v3297_v58, %v3024_v12  ;;  %v3027_v25 = vadd.f32 %v4895_v42, %v6618_v39 }
 0x23b   : > { %v2940_v15 = vpop.f32.mrf.mxu1  ;;  %v3300_v11 = vpop.f32.mrf.mxu0 }
 0x23c   : > { %3508 = vst [vmem:[%s6672_s12 + $0xa8] sm:$0xff] %v3468_v29  ;;  %v3473_v60 = vmax.f32 %v3433_v19, 0.0  ;;  %v3431_v0 = vadd.f32 %v6664_v52, %v3384_v37  ;;  %v3387_v59 = vadd.f32 %v4951_v31, %v3027_v25  ;;  %v3025_v33 = vadd.f32 %v2940_v15, %v6621_v32 }
 0x23d   : > { %v4898_v5 = vpop.f32.mrf.mxu1  ;;  %v4954_v62 = vpop.f32.mrf.mxu0 }
 0x23e   : > { %3513 = vst [vmem:[%s6672_s12 + $0xd0] sm:$0xff] %v3473_v60  ;;  %v3471_v13 = vmax.f32 %v3431_v0, 0.0  ;;  %v3434_v61 = vadd.f32 %v6664_v52, %v3387_v59  ;;  %v3385_v46 = vadd.f32 %v3300_v11, %v3025_v33  ;;  %v3030_v39 = vadd.f32 %v4898_v5, %v6624_v6 }
 0x23f   : > { %v2953_v9 = vpop.f32.mrf.mxu1  ;;  %v3313_v18 = vpop.f32.mrf.mxu0 }
 0x240   : > { %3511 = vst [vmem:[%s6672_s12 + $0xc0] sm:$0xff] %v3471_v13  ;;  %v3474_v21 = vmax.f32 %v3434_v61, 0.0  ;;  %v3432_v40 = vadd.f32 %v6664_v52, %v3385_v46  ;;  %v3390_v3 = vadd.f32 %v4954_v62, %v3030_v39  ;;  %v3028_v32 = vadd.f32 %v2953_v9, %v6627_v53 }
 0x241   : > { %v4899_v47 = vpop.f32.mrf.mxu1  ;;  %v4955_v30 = vpop.f32.mrf.mxu0 }
 0x242   : > { %3514 = vst [vmem:[%s6672_s12 + $0xd8] sm:$0xff] %v3474_v21  ;;  %v3472_v16 = vmax.f32 %v3432_v40, 0.0  ;;  %v3437_v26 = vadd.f32 %v6664_v52, %v3390_v3  ;;  %v3388_v43 = vadd.f32 %v3313_v18, %v3028_v32  ;;  %v3031_v6 = vadd.f32 %v4899_v47, %v6630_v57 }
 0x243   : > { %v2956_v54 = vpop.f32.mrf.mxu1  ;;  %v3316_v20 = vpop.f32.mrf.mxu0 }
 0x244   : > { %3512 = vst [vmem:[%s6672_s12 + $0xc8] sm:$0xff] %v3472_v16  ;;  %v3477_v10 = vmax.f32 %v3437_v26, 0.0  ;;  %v3435_v41 = vadd.f32 %v6664_v52, %v3388_v43  ;;  %v3391_v45 = vadd.f32 %v4955_v30, %v3031_v6  ;;  %v3029_v53 = vadd.f32 %v2956_v54, %v6633_v56 }
 0x245   : > { %v4902_v7 = vpop.f32.mrf.mxu1  ;;  %v4958_v27 = vpop.f32.mrf.mxu0 }
 0x246   : > { %3517 = vst [vmem:[%s6672_s12 + $0xf0] sm:$0xff] %v3477_v10  ;;  %v3475_v34 = vmax.f32 %v3435_v41, 0.0  ;;  %v3438_v38 = vadd.f32 %v6664_v52, %v3391_v45  ;;  %v3389_v55 = vadd.f32 %v3316_v20, %v3029_v53  ;;  %v3034_v57 = vadd.f32 %v4902_v7, %v6636_v50 }
 0x247   : > { %v2969_v8 = vpop.f32.mrf.mxu1  ;;  %v3329_v23 = vpop.f32.mrf.mxu0 }
 0x248   : > { %3515 = vst [vmem:[%s6672_s12 + $0xe0] sm:$0xff] %v3475_v34  ;;  %v3478_v4 = vmax.f32 %v3438_v38, 0.0  ;;  %v3436_v63 = vadd.f32 %v6664_v52, %v3389_v55  ;;  %v3394_v49 = vadd.f32 %v4958_v27, %v3034_v57  ;;  %v3032_v56 = vadd.f32 %v2969_v8, %v6639_v44 }
 0x249   : > { %v4903_v24 = vpop.f32.mrf.mxu1  ;;  %v4959_v22 = vpop.f32.mrf.mxu0 }
 0x24a   : > { %3518 = vst [vmem:[%s6672_s12 + $0xf8] sm:$0xff] %v3478_v4  ;;  %v3476_v58 = vmax.f32 %v3436_v63, 0.0  ;;  %v3441_v35 = vadd.f32 %v6664_v52, %v3394_v49  ;;  %v3392_v51 = vadd.f32 %v3329_v23, %v3032_v56  ;;  %v3035_v50 = vadd.f32 %v4903_v24, %v6642_v36 }
 0x24b   : > { %v2972_v17 = vpop.f32.mrf.mxu1  ;;  %v3332_v12 = vpop.f32.mrf.mxu0 }
 0x24c   : > { %3516 = vst [vmem:[%s6672_s12 + $0xe8] sm:$0xff] %v3476_v58  ;;  %v3481_v42 = vmax.f32 %v3441_v35, 0.0  ;;  %v3439_v31 = vadd.f32 %v6664_v52, %v3392_v51  ;;  %v3395_v29 = vadd.f32 %v4959_v22, %v3035_v50  ;;  %v3033_v44 = vadd.f32 %v2972_v17, %v6645_v28 }
 0x24d   : > { %v4906_v19 = vpop.f32.mrf.mxu1  ;;  %v4962_v37 = vpop.f32.mrf.mxu0 }
 0x24e   : > { %3521 = vst [vmem:[%s6672_s12 + $0x110] sm:$0xff] %v3481_v42  ;;  %v3479_v25 = vmax.f32 %v3439_v31, 0.0  ;;  %v3442_v15 = vadd.f32 %v6664_v52, %v3395_v29  ;;  %v3393_v11 = vadd.f32 %v3332_v12, %v3033_v44  ;;  %v3038_v36 = vadd.f32 %v4906_v19, %v6648_v48 }
 0x24f   : > { %v2985_v60 = vpop.f32.mrf.mxu1  ;;  %v3345_v0 = vpop.f32.mrf.mxu0 }
 0x250   : > { %3519 = vst [vmem:[%s6672_s12 + $0x100] sm:$0xff] %v3479_v25  ;;  %v3482_v59 = vmax.f32 %v3442_v15, 0.0  ;;  %v3440_v33 = vadd.f32 %v6664_v52, %v3393_v11  ;;  %v3398_v5 = vadd.f32 %v4962_v37, %v3038_v36  ;;  %v3036_v28 = vadd.f32 %v2985_v60, %v6651_v2 }
 0x251   : > { %v4907_v62 = vpop.f32.mrf.mxu1  ;;  %v4963_v13 = vpop.f32.mrf.mxu0 }
 0x252   : > { %3522 = vst [vmem:[%s6672_s12 + $0x118] sm:$0xff] %v3482_v59  ;;  %v3480_v61 = vmax.f32 %v3440_v33, 0.0  ;;  %v3445_v46 = vadd.f32 %v6664_v52, %v3398_v5  ;;  %v3396_v39 = vadd.f32 %v3345_v0, %v3036_v28  ;;  %v3039_v48 = vadd.f32 %v4907_v62, %v6654_v14 }
 0x253   : > { %v2988_v9 = vpop.f32.mrf.mxu1  ;;  %v3348_v3 = vpop.f32.mrf.mxu0 }
 0x254   : > { %3520 = vst [vmem:[%s6672_s12 + $0x108] sm:$0xff] %v3480_v61  ;;  %v3485_v18 = vmax.f32 %v3445_v46, 0.0  ;;  %v3443_v21 = vadd.f32 %v6664_v52, %v3396_v39  ;;  %v3399_v40 = vadd.f32 %v4963_v13, %v3039_v48  ;;  %v3037_v2 = vadd.f32 %v2988_v9, %v6657_v1 }
 0x256   : > { %3525 = vst [vmem:[%s6672_s12 + $0x130] sm:$0xff] %v3485_v18  ;;  %v3483_v32 = vmax.f32 %v3443_v21, 0.0  ;;  %v3446_v47 = vadd.f32 %v6664_v52, %v3399_v40  ;;  %v3397_v30 = vadd.f32 %v3348_v3, %v3037_v2 }
 0x258   : > { %3523 = vst [vmem:[%s6672_s12 + $0x120] sm:$0xff] %v3483_v32  ;;  %v3486_v16 = vmax.f32 %v3446_v47, 0.0  ;;  %v3444_v26 = vadd.f32 %v6664_v52, %v3397_v30 }
 0x25a   : > { %3526 = vst [vmem:[%s6672_s12 + $0x138] sm:$0xff] %v3486_v16  ;;  %v3484_v14 = vmax.f32 %v3444_v26, 0.0 }
 0x25c   : > { %3524 = vst [vmem:[%s6672_s12 + $0x128] sm:$0xff] %v3484_v14 }
 0x25d PF: > { %s13_s14 = sadd.s32 1, %s5100_s14   ;;  %s7042_s12 = smov %s5096_s13 }
 0x25e   : > { %p10_p5 = scmp.ge.s32.totalorder %s13_s14, 4   ;;  %s7043_s13 = smov %s7045_s15 }
 0x260   :  { %12 = sbr.rel (!%p10_p5) target bundleno = 2 (0x2), region = 85 }

</bundles_post_ra>
